<compile_context>
chip_gen: v7x
topology: tpu7x:2x2x1
jax: 0.10.0
libtpu: 0.0.40
codegen_flags: <defaults>
</compile_context>

<pallas_src>
import numpy as np

import jax
import jax.numpy as jnp
from jax.experimental import pallas as pl
from jax.experimental.pallas import tpu as pltpu


def _round_up(a: int, b: int) -> int:
    return -(-a // b) * b


def _make_kernel(groups: int, chunk_rows: int, n_chunks: int):
    """groups = positions packed per 128-lane row (= 128 // dim)."""

    def kernel(tab_ref, x_ref, o_ref):
        # tab_ref: (groups + 2, 128) f32, resident:
        #   rows [0, groups)  : 0/1 expand matrix  E[j, l] = (l // dim == j)
        #   row  groups       : freqs per lane     f[l % dim]  (pattern repeats)
        #   row  groups + 1   : phase per lane     0 (sin half) / pi/2 (cos half)
        # x_ref: (block_rows, groups)  — `groups` consecutive positions per row
        # o_ref: (block_rows, 128)     — row-major (positions, dim) packed
        sel = tab_ref[0:groups, :]                      # (groups, 128)
        freqs = tab_ref[groups:groups + 1, :]           # (1, 128)
        phase = tab_ref[groups + 1:groups + 2, :]       # (1, 128)

        def chunk_body(c, carry):
            r0 = pl.multiple_of(c * chunk_rows, chunk_rows)
            x = x_ref[pl.ds(r0, chunk_rows), :].astype(jnp.float32)
            # MXU expansion: xe[r, l] = x[r, l // dim]  (exact-to-f32 at HIGHEST).
            xe = jnp.dot(x, sel,
                         precision=jax.lax.Precision.HIGHEST,
                         preferred_element_type=jnp.float32)
            # Exact f32 scale + phase, single merged sin, one full-width store.
            emb = xe * freqs + phase
            o_ref[pl.ds(r0, chunk_rows), :] = jnp.sin(emb).astype(o_ref.dtype)
            return carry

        jax.lax.fori_loop(0, n_chunks, chunk_body, 0)

    return kernel


def sinusoidal_pos_emb(x, dim: int = 16, n_freq: int = 10000, *,
                       out_dtype=None, block_rows: int | None = None):
    """Pallas SinusoidalPosEmb.  x: any shape -> x.shape + (dim,).

    out_dtype: e.g. jnp.bfloat16 to halve HBM writeback (math stays f32).
    block_rows: rows of the (rows, 128) output block per grid step
                (default: sized for ~2 MiB output blocks, >=2 grid steps).
    """
    assert dim % 2 == 0, "dim must be even"
    # Fast packed-layout path needs dim to divide the 128-lane vreg width.
    # TODO(synk): generic-dim fallback (dim not dividing 128) not implemented.
    assert 128 % dim == 0, "this kernel requires 128 % dim == 0 (dim=16 default)"

    if x.dtype not in (jnp.float32, jnp.bfloat16):
        x = x.astype(jnp.float32)
    out_dtype = x.dtype if out_dtype is None else jnp.dtype(out_dtype)
    out_itemsize = jnp.dtype(out_dtype).itemsize

    half = dim // 2
    groups = 128 // dim                      # positions packed per output row
    orig_shape = x.shape
    N = int(np.prod(orig_shape)) if orig_shape else 1
    R = _round_up(N, groups) // groups       # rows of `groups` positions

    # --- tile selection: ~2 MiB output blocks, >=2 grid steps when possible ---
    if block_rows is None:
        target_rows = max(16, min(4096, (2 * 1024 * 1024) // (128 * out_itemsize)))
        block_rows = min(target_rows, _round_up(-(-R // 2), 16))
    if block_rows > 256:
        block_rows = _round_up(block_rows, 256)
    else:
        block_rows = _round_up(max(block_rows, 16), 16)
    chunk_rows = min(block_rows, 256)        # bounds per-chunk vreg pressure
    n_chunks = block_rows // chunk_rows
    R_pad = _round_up(R, block_rows)
    N_pad = R_pad * groups
    grid = (R_pad // block_rows,)

    # --- flatten + pad input; (rows, groups) positions-per-row layout ---
    x_flat = x.reshape(-1)
    if N_pad != N:
        x_flat = jnp.pad(x_flat, (0, N_pad - N))
    x2 = x_flat.reshape(R_pad, groups)

    # --- host-precomputed lane-dense constant table (no in-kernel exp) ---
    lanes = np.arange(128)
    ch = lanes % dim
    sel = (lanes[None, :] // dim == np.arange(groups)[:, None]).astype(np.float32)
    log_nf = np.log(np.float32(n_freq))
    freq_half = np.exp(np.arange(half, dtype=np.float32)
                       * (np.float32(-1.0) * log_nf / np.float32(half)))
    freqs_lane = freq_half[ch % half].astype(np.float32)
    phase_lane = np.where(ch >= half, np.float32(np.pi / 2.0),
                          np.float32(0.0)).astype(np.float32)
    tab = jnp.asarray(np.concatenate(
        [sel, freqs_lane[None, :], phase_lane[None, :]], axis=0))   # (groups+2,128)

    cost = pl.CostEstimate(
        flops=2 * N_pad * 128 + 2 * N_pad * dim,     # expand-dot + scale/phase
        transcendentals=N_pad * dim,                 # one sin per output element
        bytes_accessed=N_pad * x2.dtype.itemsize + int(tab.size) * 4
        + R_pad * 128 * out_itemsize,
    )

    out2 = pl.pallas_call(
        _make_kernel(groups, chunk_rows, n_chunks),
        out_shape=jax.ShapeDtypeStruct((R_pad, 128), out_dtype),
        grid_spec=pltpu.PrefetchScalarGridSpec(
            num_scalar_prefetch=0,
            grid=grid,
            in_specs=[
                # lane-dense constant table, resident across all steps
                pl.BlockSpec((groups + 2, 128), lambda i: (0, 0)),
                # input tile: block_rows rows of `groups` positions
                pl.BlockSpec((block_rows, groups), lambda i: (i, 0)),
            ],
            # lane-dense output block; HBM layout == row-major (N, dim)
            out_specs=pl.BlockSpec((block_rows, 128), lambda i: (i, 0)),
        ),
        compiler_params=pltpu.CompilerParams(
            dimension_semantics=("parallel",),
        ),
        cost_estimate=cost,
    )(tab, x2)

    # Free reshape (same contiguous layout); slice only if we padded.
    out = out2.reshape(R_pad * groups, dim)
    if N_pad != N:
        out = out[:N]
    return out.reshape(*orig_shape, dim)


def sinusoidal_pos_emb_ref(x, dim: int = 16, n_freq: int = 10000):
    """Pure-JAX reference matching the PyTorch module (divisor = half)."""
    half = dim // 2
    scale = jnp.log(jnp.float32(n_freq)) / half
    freqs = jnp.exp(jnp.arange(half, dtype=jnp.float32) * -scale)
    emb = x[..., None].astype(jnp.float32) * freqs
    return jnp.concatenate([jnp.sin(emb), jnp.cos(emb)], axis=-1).astype(x.dtype)


if __name__ == "__main__":
    key = jax.random.PRNGKey(0)
    B, S, DIM, N_FREQ = 4, 256, 16, 10000

    # e.g. pulse times / positions as raw scalars per element.
    x = jax.random.normal(key, (B, S), dtype=jnp.float32) * 10.0

    # Default tiling here: N=1024 -> 128 packed rows -> block_rows=64 -> grid=(2,)
    out = jax.block_until_ready(sinusoidal_pos_emb(x, dim=DIM, n_freq=N_FREQ))
    assert out.shape == (B, S, DIM)

    ref = sinusoidal_pos_emb_ref(x, dim=DIM, n_freq=N_FREQ)
    # atol covers the documented ~1e-5 deviation from cos = sin(+pi/2) and the
    # HIGHEST-precision MXU expansion (see header correctness notes).
    np.testing.assert_allclose(np.asarray(out), np.asarray(ref),
                               rtol=1e-5, atol=1e-4)

    print("KERNEL_OK")
</pallas_src>

<mosaic_0001>
module attributes {stable_mosaic.version = 11 : i64} {
  func.func @kernel(%arg0: i32, %arg1: memref<10x128xf32, #tpu.memory_space<vmem>>, %arg2: memref<64x8xf32, #tpu.memory_space<vmem>>, %arg3: memref<64x128xf32, #tpu.memory_space<vmem>>) attributes {dimension_semantics = [#tpu.dimension_semantics<parallel>], iteration_bounds = array<i64: 2>, scalar_prefetch = 0 : i64, scratch_operands = 0 : i64, tpu.core_type = #tpu.core_type<tc>, window_params = [{pipeline_mode = #tpu.pipeline_mode<synchronous>, transform_indices = @transform_0, window_bounds = array<i64: 10, 128>}, {transform_indices = @transform_1, window_bounds = array<i64: 64, 8>}, {transform_indices = @transform_2, window_bounds = array<i64: 64, 128>}]} {
    %c0 = arith.constant 0 : index
    %c0_0 = arith.constant 0 : index
    %0 = vector.load %arg1[%c0, %c0_0] : memref<10x128xf32, #tpu.memory_space<vmem>>, vector<8x128xf32>
    %c8 = arith.constant 8 : index
    %c0_1 = arith.constant 0 : index
    %1 = vector.load %arg1[%c8, %c0_1] : memref<10x128xf32, #tpu.memory_space<vmem>>, vector<1x128xf32>
    %c9 = arith.constant 9 : index
    %c0_2 = arith.constant 0 : index
    %2 = vector.load %arg1[%c9, %c0_2] : memref<10x128xf32, #tpu.memory_space<vmem>>, vector<1x128xf32>
    %c0_i32 = arith.constant 0 : i32
    %c64_i32 = arith.constant 64 : i32
    %3 = arith.muli %c0_i32, %c64_i32 : i32
    %4 = tpu.assume_multiple %3, 64 : i32
    %5 = arith.index_cast %4 : i32 to index
    %c0_3 = arith.constant 0 : index
    %6 = vector.load %arg2[%5, %c0_3] : memref<64x8xf32, #tpu.memory_space<vmem>>, vector<64x8xf32>
    %cst = arith.constant dense<0.000000e+00> : vector<64x128xf32>
    %7 = tpu.matmul %6, %0, %cst {dimension_numbers = #tpu.dot_dimension_numbers<[1], [0], [0], [1], [0, 0, 1, 1], [], []>, precision = #tpu.contract_precision<fp32>} : vector<64x8xf32>, vector<8x128xf32>, vector<64x128xf32> -> vector<64x128xf32>
    %8 = vector.broadcast %1 : vector<1x128xf32> to vector<64x128xf32>
    %9 = arith.mulf %7, %8 : vector<64x128xf32>
    %10 = vector.broadcast %2 : vector<1x128xf32> to vector<64x128xf32>
    %11 = arith.addf %9, %10 : vector<64x128xf32>
    %12 = math.sin %11 : vector<64x128xf32>
    %13 = arith.index_cast %4 : i32 to index
    %c0_4 = arith.constant 0 : index
    %14 = vector.load %arg3[%13, %c0_4] : memref<64x128xf32, #tpu.memory_space<vmem>>, vector<64x128xf32>
    tpu.vector_store %arg3[%13, %c0_4], %12 {strides = array<i32>} : memref<64x128xf32, #tpu.memory_space<vmem>>, vector<64x128xf32>,
    %c1_i32 = arith.constant 1 : i32
    return
  }
  func.func @transform_0(%arg0: i32) -> (i32, i32) {
    %c0_i32 = arith.constant 0 : i32
    %c0_i32_0 = arith.constant 0 : i32
    %c0_i32_1 = arith.constant 0 : i32
    return %c0_i32, %c0_i32_0 : i32, i32
  }
  func.func @transform_1(%arg0: i32) -> (i32, i32) {
    %c0_i32 = arith.constant 0 : i32
    %c0_i32_0 = arith.constant 0 : i32
    return %arg0, %c0_i32 : i32, i32
  }
  func.func @transform_2(%arg0: i32) -> (i32, i32) {
    %c0_i32 = arith.constant 0 : i32
    %c0_i32_0 = arith.constant 0 : i32
    return %arg0, %c0_i32 : i32, i32
  }
}

</mosaic_0001>

<bundles_post_ra>
// kernel: tpu_custom_call.1
= control target key start
LH: loop header
LB: loop body
LE: loop exit
PB: predicated region body
PF: predicated region fallthrough
CT: control target
= control target key end

     0   :  { %7 = vsyncpa [#allocation3], 0  ;;  %s3224_s0 = inlined_call_operand.vmem [shape: f32[10,128], index: 0, kind: input, shape index: {}]   ;;  %s3225_s1 = inlined_call_operand.vmem [shape: f32[128,8], index: 1, kind: input, shape index: {}]   ;;  %s3226_s2 = inlined_call_operand.hbm [shape: f32[128,128], index: 2, kind: output, shape index: {}]  }
   0x1   :  { %9 = vsyncpa [#allocation3 + $0x1], 0  ;;  %s2294_s9 = smov 0   ;;  %s2296_s10 = smov 0  }
   0x2   :  { %s2298_s11 = smov 0   ;;  %s2300_s12 = smov 0  }
   0x3 LB: > { %s2315_s13 = sadd.s32 4294967295, %s2268_s12   ;;  %s1868_s14 = sadd.s32 4294967294, %s2268_s12   ;;  %s2268_s12 = sphi %s2300_s12, %s3244_s12   ;;  %s2264_s11 = sphi %s2298_s11, %s3243_s11   ;;  %s2260_s10 = sphi %s2296_s10, %s3242_s10   ;;  %s2256_s9 = sphi %s2294_s9, %s3241_s9  }
   0x4   : > { %s2319_s15 = sadd.s32 1, %s2268_s12   ;;  %s69_s16 = sadd.s32 1, %s2264_s11 }
   0x5   : > { %s66_s17 = ssub.s32 %s2268_s12, %s2319_s15  ;;  %p79_p0 = scmp.ne.s32.totalorder %s2264_s11, %s2260_s10 }
   0x6   : > { %p67_p1 = scmp.eq.s32.totalorder %s66_s17, 0  ;;  %p80_p2 = scmp.eq.s32.totalorder %s2315_s13, 1 }
   0x7   : > { %p85_p3 = scmp.ne.s32.totalorder %s2260_s10, %s2256_s9  ;;  %p86_p4 = scmp.eq.s32.totalorder %s1868_s14, 1 }
   0x8   : > { %s2330_s18 = scalar_select %p67_p1, %s2264_s11, %s69_s16  }
   0x9   : > { %p2332_p5 = por %p80_p2, %p79_p0  ;;  %p2336_p6 = por %p86_p4, %p85_p3 }
   0xa   : > { %p1871_p7 = scmp.ge.s32.totalorder %s2268_s12, 1  ;;  %p116_p8 = scmp.lt.s32.totalorder %s2268_s12, 3 }
   0xc   : > { %p117_p9 = pnand %p1871_p7, %p116_p8 }
   0xd   : > { %v145_v0 = vld [vmem:[%s3224_s0] sm:$0xff] (!%p117_p9)  ;;  %s1873_s23 = sshll.u32 (!%p117_p9), %s2315_s13, 3  ;;  %vm156_vm0 = vcmask (!%p117_p9), 64512   ;;  %s135_s4 = sand.u32 (!%p117_p9), 1, %s2260_s10  }
   0xe   : > { %120 = sbr.rel (%p117_p9) target bundleno = 538 (0x21a), region = 28  ;;  %v2346_v1 = vand.u32 (!%p117_p9), 4294901760, %v145_v0  ;;  %p139_p10 = scmp.lt.s32.totalorder (!%p117_p9), %s1873_s23, 15 }
   0xf   : > { %s1872_s5 = sshll.u32 (!%p117_p9), %s135_s4, 6  ;;  %s1914_s17 = sshll.u32 (!%p117_p9), %s2315_s13, 10 }
  0x10   : > { %2011 = vmatprep.subr.mxu0 (!%p117_p9), %v2346_v1  ;;  %1969 = vmatprep.subr.mxu1 (!%p117_p9), %v2346_v1  ;;  %v2351_v2 = vsub.f32 (!%p117_p9), %v145_v0, %v2346_v1  ;;  %v2463_v0 = vld [vmem:[%s3224_s0 + $0x8] ss:$0 sm:$0xff] (!%p117_p9)  ;;  %s2763_s6 = scalar_lea.vmem (!%p117_p9), [#allocation2], %s1872_s5  ;;  %s3183_s13 = scalar_lea.sflag (!%p117_p9), [#allocation3], %s135_s4 }
  0x11   : > { %2012 = vmatpush3.msra.mxu0 (!%p117_p9), %v2346_v1  ;;  %1970 = vmatpush3.msra.mxu1 (!%p117_p9), %v2346_v1  ;;  %s1806_s21 = sshll.u32 (!%p117_p9), %s2763_s6, 4  ;;  %s2276_s26 = smov (!%p117_p9), [#allocation2]   ;;  %s3177_s21 = int_to_ptr.vmem [resolvable:$true] %s1806_s21 }
  0x12   : > { %v330_v3 = vand.u32 (!%p117_p9), 4294901760, %v2351_v2  ;;  %s2206_s25 = scalar_lea.vmem (!%p117_p9), %s3177_s21, 1024 }
  0x13   : > { %p2207_p11 = scmp.ne.s32.totalorder (!%p117_p9), %s3177_s21, %s2206_s25 }
  0x14   : > { %v331_v6 = vsub.f32 (!%p117_p9), %v2351_v2, %v330_v3  ;;  %2025 = vmatprep.subr.mxu0 (!%p117_p9), %v330_v3 }
  0x15   : > { %s3246_s23 = smov (!%p139_p10, %s1873_s23), 15  ;;  %p2208_p12 = pnand %p2207_p11, %p2332_p5 }
  0x16   : > { %s1874_s24 = sshll.u32 %s3246_s23, 3  ;;  %v332_v16 = vand.u32 4294901760, %v331_v6  ;;  %v2468_v6 = vld [vmem:[%s3224_s0 + $0x9] ss:$0 sm:$0xff] }
  0x17   : > { %s142_s27 = scalar_lea.vmem %s3225_s1, %s1874_s24  ;;  %s3175_s24 = scalar_lea.hbm %s3226_s2, %s1914_s17 }
  0x18   : > { %v148_v4 = vld [vmem:[%s142_s27] sm:$0xff]  ;;  %v149_v5 = vld [vmem:[%s142_s27 + $0x8] sm:$0xff]  ;;  %v150_v7 = vld [vmem:[%s142_s27 + $0x10] sm:$0xff]  ;;  %1983 = vmatprep.subr.mxu1 %v332_v16  ;;  %p2209_p13 = pneg %p2208_p12 }
  0x19   : > { %v158_v8 = vsel %vm156_vm0, %v148_v4, 0  ;;  %v161_v9 = vsel %vm156_vm0, %v149_v5, 0  ;;  %v164_v10 = vsel %vm156_vm0, %v150_v7, 0  ;;  %v151_v11 = vld [vmem:[%s142_s27 + $0x18] sm:$0xff]  ;;  %v152_v12 = vld [vmem:[%s142_s27 + $0x20] sm:$0xff]  ;;  %v153_v13 = vld [vmem:[%s142_s27 + $0x28] sm:$0xff] }
  0x1a   : > { %v2363_v14 = vand.u32 4294901760, %v158_v8  ;;  %v2365_v15 = vand.u32 4294901760, %v161_v9  ;;  %v2367_v17 = vand.u32 4294901760, %v164_v10  ;;  %v154_v18 = vld [vmem:[%s142_s27 + $0x30] sm:$0xff]  ;;  %v155_v19 = vld [vmem:[%s142_s27 + $0x38] sm:$0xff]  ;;  %v167_v20 = vsel %vm156_vm0, %v151_v11, 0 }
  0x1b   : > { %v170_v21 = vsel %vm156_vm0, %v152_v12, 0  ;;  %v173_v22 = vsel %vm156_vm0, %v153_v13, 0  ;;  %v176_v23 = vsel %vm156_vm0, %v154_v18, 0  ;;  %v2382_v27 = vand.u32 4294901760, %v167_v20  ;;  %s2210_s27 = sshll.u32 %s2276_s26, 4  ;;  %s2211_s27 = int_to_ptr.vmem [resolvable:$false] %s2210_s27 }
  0x1c   : > { %v2374_v24 = vsub.f32 %v158_v8, %v2363_v14  ;;  %v2377_v25 = vsub.f32 %v161_v9, %v2365_v15  ;;  %v2380_v26 = vsub.f32 %v164_v10, %v2367_v17  ;;  %v2384_v28 = vand.u32 4294901760, %v170_v21  ;;  %s2212_s28 = scalar_lea.vmem %s2211_s27, 2048  ;;  %p2213_p0 = scmp.lt.s32.totalorder %s3177_s21, %s2211_s27 }
  0x1d   : > { %v2386_v29 = vand.u32 4294901760, %v173_v22  ;;  %v2388_v30 = vand.u32 4294901760, %v176_v23  ;;  %v179_v31 = vsel %vm156_vm0, %v155_v19, 0  ;;  %v2395_v35 = vsub.f32 %v167_v20, %v2382_v27  ;;  %p2214_p1 = scmp.lt.s32.totalorder %s2212_s28, %s2206_s25 }
  0x1e   : > { %v249_v32 = vand.u32 4294901760, %v2374_v24  ;;  %v259_v33 = vand.u32 4294901760, %v2377_v25  ;;  %v269_v34 = vand.u32 4294901760, %v2380_v26  ;;  %v2398_v36 = vsub.f32 %v170_v21, %v2384_v28 }
  0x1f   : > { %v2401_v37 = vsub.f32 %v173_v22, %v2386_v29  ;;  %v2404_v38 = vsub.f32 %v176_v23, %v2388_v30  ;;  %v2406_v39 = vand.u32 4294901760, %v179_v31  ;;  %v279_v42 = vand.u32 4294901760, %v2395_v35  ;;  %p2215_p2 = por %p2214_p1, %p2213_p0 }
  0x20   : > { %2013 = vmatprep.mubr.f32.mxu0 %v249_v32  ;;  %v250_v40 = vsub.f32 %v2374_v24, %v249_v32  ;;  %v260_v41 = vsub.f32 %v2377_v25, %v259_v33  ;;  %v270_v43 = vsub.f32 %v2380_v26, %v269_v34  ;;  %v289_v44 = vand.u32 4294901760, %v2398_v36 }
  0x21   : > { %2014 = vmatmul.mubr.f32.vlgmr.msra.gmra.mrb[0].mxu0 %v259_v33  ;;  %v299_v45 = vand.u32 4294901760, %v2401_v37  ;;  %v309_v46 = vand.u32 4294901760, %v2404_v38  ;;  %v2416_v47 = vsub.f32 %v179_v31, %v2406_v39  ;;  %v280_v51 = vsub.f32 %v2395_v35, %v279_v42  ;;  %p2216_p3 = pnand %p2215_p2, %p2209_p13 }
  0x22   : > { %v251_v48 = vand.u32 4294901760, %v250_v40  ;;  %2016 = vmatprep.mubr.f32.mxu0 %v269_v34  ;;  %v261_v49 = vand.u32 4294901760, %v260_v41  ;;  %2026 = vmatpush3.msra.mxu0 %v330_v3  ;;  %v271_v50 = vand.u32 4294901760, %v270_v43  ;;  %v290_v52 = vsub.f32 %v2398_v36, %v289_v44 }
  0x23   : > { %2039 = vmatprep.subr.mxu0 %v2346_v1  ;;  %v281_v53 = vand.u32 4294901760, %v280_v51  ;;  %v300_v54 = vsub.f32 %v2401_v37, %v299_v45  ;;  %v319_v55 = vand.u32 4294901760, %v2416_v47  ;;  %v310_v57 = vsub.f32 %v2404_v38, %v309_v46 }
  0x24   : > { %1971 = vmatprep.mubr.f32.mxu1 %v251_v48  ;;  %v291_v56 = vand.u32 4294901760, %v290_v52 }
  0x25   : > { %1972 = vmatmul.mubr.f32.vlgmr.msra.gmra.mrb[0].mxu1 %v261_v49  ;;  %2017 = vmatmul.mubr.f32.gmra.mrb[2].mxu0 %v279_v42  ;;  %v301_v58 = vand.u32 4294901760, %v300_v54  ;;  %v320_v59 = vsub.f32 %v2416_v47, %v319_v55  ;;  %v311_v60 = vand.u32 4294901760, %v310_v57  ;;  %v2270_v54 = vmov 683565275  }
  0x26   : > { %1984 = vmatpush3.msra.mxu1 %v332_v16  ;;  %1974 = vmatprep.mubr.f32.mxu1 %v271_v50 }
  0x27   : > { %2019 = vmatprep.mubr.f32.mxu0 %v289_v44  ;;  %1997 = vmatprep.subr.mxu1 %v2351_v2  ;;  %v321_v61 = vand.u32 4294901760, %v320_v59 }
  0x29   : > { %1975 = vmatmul.mubr.f32.gmra.mrb[2].mxu1 %v281_v53  ;;  %2020 = vmatmul.mubr.f32.gmra.mrb[4].mxu0 %v299_v45 }
  0x2a   : > { %1977 = vmatprep.mubr.f32.mxu1 %v291_v56  ;;  %2022 = vmatprep.mubr.f32.mxu0 %v309_v46 }
  0x2d   : > { %1978 = vmatmul.mubr.f32.gmra.mrb[4].mxu1 %v301_v58  ;;  %2023 = vmatmul.mubr.f32.gmra.mrb[6].mxu0 %v319_v55  ;;  %v2271_v58 = vmov 2475754826  }
  0x2e   : > { %1980 = vmatprep.mubr.f32.mxu1 %v311_v60  ;;  %2027 = vmatprep.mubr.f32.mxu0 %v2363_v14  ;;  %v2272_v60 = vmov 2131351028  }
  0x31   : > { %1981 = vmatmul.mubr.f32.gmra.mrb[6].mxu1 %v321_v61  ;;  %2028 = vmatmul.mubr.f32.vlgmr.msra.gmra.mrb[0].mxu0 %v2365_v15 }
  0x32   : > { %1985 = vmatprep.mubr.f32.mxu1 %v2363_v14  ;;  %2030 = vmatprep.mubr.f32.mxu0 %v2367_v17 }
  0x33   : > { %2040 = vmatpush3.msra.mxu0 %v2346_v1 }
  0x35   : > { %1986 = vmatmul.mubr.f32.vlgmr.msra.gmra.mrb[0].mxu1 %v2365_v15  ;;  %2031 = vmatmul.mubr.f32.gmra.mrb[2].mxu0 %v2382_v27 }
  0x36   : > { %1998 = vmatpush3.msra.mxu1 %v2351_v2  ;;  %1988 = vmatprep.mubr.f32.mxu1 %v2367_v17 }
  0x37   : > { %2033 = vmatprep.mubr.f32.mxu0 %v2384_v28 }
  0x39   : > { %1989 = vmatmul.mubr.f32.gmra.mrb[2].mxu1 %v2382_v27  ;;  %2034 = vmatmul.mubr.f32.gmra.mrb[4].mxu0 %v2386_v29 }
  0x3a   : > { %1991 = vmatprep.mubr.f32.mxu1 %v2384_v28  ;;  %2036 = vmatprep.mubr.f32.mxu0 %v2388_v30 }
  0x3d   : > { %1992 = vmatmul.mubr.f32.gmra.mrb[4].mxu1 %v2386_v29  ;;  %2037 = vmatmul.mubr.f32.gmra.mrb[6].mxu0 %v2406_v39 }
  0x3e   : > { %1994 = vmatprep.mubr.f32.mxu1 %v2388_v30  ;;  %2041 = vmatprep.mubr.f32.mxu0 %v2363_v14 }
  0x41   : > { %1995 = vmatmul.mubr.f32.gmra.mrb[6].mxu1 %v2406_v39  ;;  %2042 = vmatmul.mubr.f32.vlgmr.msra.gmra.mrb[0].mxu0 %v2365_v15 }
  0x42   : > { %1999 = vmatprep.mubr.f32.mxu1 %v2374_v24  ;;  %2044 = vmatprep.mubr.f32.mxu0 %v2367_v17 }
  0x45   : > { %2000 = vmatmul.mubr.f32.vlgmr.msra.gmra.mrb[0].mxu1 %v2377_v25  ;;  %2045 = vmatmul.mubr.f32.gmra.mrb[2].mxu0 %v2382_v27 }
  0x46   : > { %2002 = vmatprep.mubr.f32.mxu1 %v2380_v26  ;;  %2047 = vmatprep.mubr.f32.mxu0 %v2384_v28 }
  0x49   : > { %2003 = vmatmul.mubr.f32.gmra.mrb[2].mxu1 %v2395_v35  ;;  %2048 = vmatmul.mubr.f32.gmra.mrb[4].mxu0 %v2386_v29 }
  0x4a   : > { %2005 = vmatprep.mubr.f32.mxu1 %v2398_v36  ;;  %2050 = vmatprep.mubr.f32.mxu0 %v2388_v30 }
  0x4d   : > { %2006 = vmatmul.mubr.f32.gmra.mrb[4].mxu1 %v2401_v37  ;;  %2051 = vmatmul.mubr.f32.gmra.mrb[6].mxu0 %v2406_v39 }
  0x4e   : > { %2008 = vmatprep.mubr.f32.mxu1 %v2404_v38 }
  0x51   : > { %2009 = vmatmul.mubr.f32.gmra.mrb[6].mxu1 %v2416_v47 }
 0x114   : > { %v2043_v62 = vpop.f32.mrb[0].mxu0 }
 0x115   : > { %v882_v63 = vpop.f32.mrb[1].mxu0 }
 0x118   : > { %v2001_v1 = vpop.f32.mrb[0].mxu1  ;;  %v2046_v2 = vpop.f32.mrb[2].mxu0 }
 0x119   : > { %v2053_v3 = vadd.f32 %v2043_v62, %v2001_v1  ;;  %v515_v4 = vpop.f32.mrb[1].mxu1  ;;  %v894_v5 = vpop.f32.mrb[3].mxu0  ;;  %v2273_v62 = vmov 2102212464   ;;  %v2274_v1 = vmov 920167782  }
 0x11a   : > { %v2054_v7 = vadd.f32 %v882_v63, %v515_v4 }
 0x11b   : > { %v933_v8 = vmul.f32 %v2053_v3, %v2463_v0 }
 0x11c   : > { %v932_v9 = vmul.f32 %v2054_v7, %v2463_v0  ;;  %v2004_v10 = vpop.f32.mrb[2].mxu1  ;;  %v2049_v11 = vpop.f32.mrb[4].mxu0 }
 0x11d   : > { %v2473_v12 = vadd.f32 %v2468_v6, %v933_v8  ;;  %v2055_v13 = vadd.f32 %v2046_v2, %v2004_v10  ;;  %v529_v14 = vpop.f32.mrb[3].mxu1  ;;  %v906_v15 = vpop.f32.mrb[5].mxu0 }
 0x11e   : > { %v2476_v16 = vadd.f32 %v2468_v6, %v932_v9  ;;  %v2056_v17 = vadd.f32 %v894_v5, %v529_v14  ;;  %v2275_v9 = vmov 1326507024  }
 0x11f   : > { %v1056_v18 = vand.u32 2147483647, %v2473_v12  ;;  %v1059_v19 = vand.u32 2139095040, %v2473_v12  ;;  %v935_v25 = vmul.f32 %v2055_v13, %v2463_v0  ;;  %vm1058_vm14 = vcmp.lt.s32.totalorder %v2473_v12, 0 }
 0x120   : > { %v952_v20 = vand.u32 2147483647, %v2476_v16  ;;  %v955_v21 = vand.u32 2139095040, %v2476_v16  ;;  %v2007_v22 = vpop.f32.mrb[4].mxu1  ;;  %v2482_v23 = vpop.f32.mrb[6].mxu0  ;;  %v2504_v48 = vmul.f32 %v2056_v17, %v2463_v0  ;;  %vm954_vm0 = vcmp.lt.s32.totalorder %v2476_v16, 0 }
 0x121   : > { %v1060_v24 = vshrl.u32 %v1059_v19, 23  ;;  %v543_v26 = vpop.f32.mrb[5].mxu1  ;;  %v1063_v27 = vand.u32 8388607, %v1056_v18  ;;  %v2489_v30 = vpop.f32.mrb[7].mxu0  ;;  %v2492_v32 = vadd.f32 %v2468_v6, %v935_v25  ;;  %v2494_v33 = vadd.f32 %v2049_v11, %v2007_v22 }
 0x122   : > { %v956_v28 = vshrl.u32 %v955_v21, 23  ;;  %v959_v29 = vand.u32 8388607, %v952_v20  ;;  %v2496_v35 = vadd.f32 %v906_v15, %v543_v26  ;;  %vm2591_vm15 = vcmp.le.f32.partialorder %v1056_v18, 0.7853982 }
 0x123   : > { %v1881_v31 = vadd.s32 4294967169, %v1060_v24  ;;  %v1064_v38 = vor.u32 8388608, %v1063_v27  ;;  %v1267_v41 = vand.u32 2139095040, %v2492_v32  ;;  %v1264_v52 = vand.u32 2147483647, %v2492_v32 }
 0x124   : > { %v1877_v34 = vadd.s32 4294967169, %v956_v28  ;;  %v2498_v36 = vpop.f32.mrb[6].mxu1  ;;  %v960_v39 = vor.u32 8388608, %v959_v29 }
 0x125   : > { %v1066_v37 = vadd.s32 1, %v1881_v31  ;;  %v2501_v42 = vpop.f32.mrb[7].mxu1  ;;  %v1268_v44 = vshrl.u32 %v1267_v41, 23  ;;  %v2506_v49 = vshll.u32 %v1064_v38, 8 }
 0x126   : > { %v962_v40 = vadd.s32 1, %v1877_v34  ;;  %v2510_v51 = vshll.u32 %v960_v39, 8 }
 0x127   : > { %vm1067_vm1 = vcmp.gt.s32.totalorder %v1066_v37, 0  ;;  %v2514_v57 = vadd.s32 4294967169, %v1268_v44 }
 0x128   : > { %v1068_v43 = vsel %vm1067_vm1, %v1066_v37, 0  ;;  %vm963_vm2 = vcmp.gt.s32.totalorder %v962_v40, 0 }
 0x129   : > { %v1069_v45 = vshrl.u32 %v1068_v43, 5  ;;  %v1070_v46 = vand.u32 31, %v1068_v43  ;;  %v964_v47 = vsel %vm963_vm2, %v962_v40, 0 }
 0x12a   : > { %v2508_v50 = vshrl.u32 %v964_v47, 5  ;;  %v966_v56 = vand.u32 31, %v964_v47 }
 0x12b   : > { %v1071_v53 = vsub.s32 32, %v1070_v46  ;;  %v1073_v55 = vshll.u32 %v2270_v54, %v1070_v46  ;;  %v1076_v59 = vshll.u32 %v2271_v58, %v1070_v46  ;;  %v1079_v61 = vshll.u32 %v2272_v60, %v1070_v46 }
 0x12c   : > { %v1082_v63 = vshll.u32 %v2273_v62, %v1070_v46  ;;  %v1085_v2 = vshll.u32 %v2274_v1, %v1070_v46  ;;  %vm1088_vm3 = vcmp.lt.s32.totalorder %v1069_v45, 1  ;;  %vm1089_vm4 = vcmp.lt.s32.totalorder %v1069_v45, 2 }
 0x12d   : > { %v1074_v3 = vshrl.u32 %v2271_v58, %v1071_v53  ;;  %v1077_v4 = vshrl.u32 %v2272_v60, %v1071_v53  ;;  %v1080_v5 = vshrl.u32 %v2273_v62, %v1071_v53  ;;  %v1072_v7 = vshrl.u32 %v2270_v54, %v1071_v53 }
 0x12e   : > { %v1083_v8 = vshrl.u32 %v2274_v1, %v1071_v53  ;;  %v1086_v10 = vshrl.u32 %v2275_v9, %v1071_v53  ;;  %v967_v15 = vsub.s32 32, %v966_v56  ;;  %vm1090_vm5 = vcmp.lt.s32.totalorder %v1069_v45, 3 }
 0x12f   : > { %v1075_v11 = vor.u32 %v1074_v3, %v1073_v55  ;;  %v1078_v13 = vor.u32 %v1077_v4, %v1076_v59  ;;  %v1081_v14 = vor.u32 %v1080_v5, %v1079_v61  ;;  %vm1091_vm6 = vcmp.lt.s32.totalorder %v1069_v45, 4 }
 0x130   : > { %v1084_v17 = vor.u32 %v1083_v8, %v1082_v63  ;;  %v1087_v19 = vor.u32 %v1086_v10, %v1085_v2  ;;  %v969_v29 = vshll.u32 %v2270_v54, %v966_v56  ;;  %v970_v37 = vshrl.u32 %v2271_v58, %v967_v15 }
 0x131   : > { %v1092_v21 = vsel %vm1088_vm3, %v1072_v7, %v1075_v11  ;;  %v1093_v22 = vsel %vm1091_vm6, %v1081_v14, 2102212464  ;;  %v1096_v24 = vsel %vm1088_vm3, %v1075_v11, %v1078_v13  ;;  %v1100_v25 = vsel %vm1088_vm3, %v1078_v13, %v1081_v14 }
 0x132   : > { %v1094_v26 = vsel %vm1090_vm5, %v1078_v13, %v1093_v22  ;;  %v1097_v27 = vsel %vm1091_vm6, %v1084_v17, 920167782  ;;  %v1101_v28 = vsel %vm1091_vm6, %v1087_v19, 1326507024  ;;  %v972_v38 = vshll.u32 %v2271_v58, %v966_v56 }
 0x133   : > { %v1098_v31 = vsel %vm1090_vm5, %v1081_v14, %v1097_v27  ;;  %v1102_v34 = vsel %vm1090_vm5, %v1084_v17, %v1101_v28  ;;  %v1095_v39 = vsel %vm1089_vm4, %v1092_v21, %v1094_v26  ;;  %v973_v43 = vshrl.u32 %v2272_v60, %v967_v15 }
 0x134   : > { %v1099_v40 = vsel %vm1089_vm4, %v1096_v24, %v1098_v31  ;;  %v1103_v41 = vsel %vm1089_vm4, %v1100_v25, %v1102_v34  ;;  %v971_v55 = vor.u32 %v970_v37, %v969_v29  ;;  %v975_v61 = vshll.u32 %v2272_v60, %v966_v56 }
 0x135   : > { %v2537_v44 = vmul.u32.u64.low %v2506_v49, %v1103_v41  ;;  %v2538_v46 = vmul.u32.u64.high %v2506_v49, %v1103_v41, %v2537_v44  ;;  %v2541_v47 = vmul.u32.u64.low %v2506_v49, %v1099_v40  ;;  %v2542_v53 = vmul.u32.u64.high %v2506_v49, %v1099_v40, %v2541_v47 }
 0x136   : > { %v974_v59 = vor.u32 %v973_v43, %v972_v38  ;;  %v976_v63 = vshrl.u32 %v2273_v62, %v967_v15  ;;  %v968_v2 = vshrl.u32 %v2270_v54, %v967_v15  ;;  %v978_v45 = vshll.u32 %v2273_v62, %v966_v56 }
 0x137   : > { %v979_v3 = vshrl.u32 %v2274_v1, %v967_v15  ;;  %v982_v4 = vshrl.u32 %v2275_v9, %v967_v15  ;;  %v1111_v5 = vmul.u32 %v2506_v49, %v1095_v39  ;;  %v981_v8 = vshll.u32 %v2274_v1, %v966_v56 }
 0x138   : > { %v977_v7 = vor.u32 %v976_v63, %v975_v61  ;;  %vm984_vm7 = vcmp.lt.s32.totalorder %v2508_v50, 1  ;;  %vm1113_vm8 = vc.u32 %v2538_v46, %v2541_v47  ;;  %v1114_v10 = vadd.s32 1, %v2542_v53 }
 0x139   : > { %v980_v11 = vor.u32 %v979_v3, %v978_v45  ;;  %vm985_vm9 = vcmp.lt.s32.totalorder %v2508_v50, 2  ;;  %v983_v13 = vor.u32 %v982_v4, %v981_v8  ;;  %vm986_vm10 = vcmp.lt.s32.totalorder %v2508_v50, 3 }
 0x13a   : > { %vm987_vm11 = vcmp.lt.s32.totalorder %v2508_v50, 4  ;;  %v992_v14 = vsel %vm984_vm7, %v971_v55, %v974_v59  ;;  %v1115_v49 = vsel %vm1113_vm8, %v1114_v10, %v2542_v53  ;;  %v996_v56 = vsel %vm984_vm7, %v974_v59, %v977_v7 }
 0x13b   : > { %v989_v15 = vsel %vm987_vm11, %v977_v7, 2102212464  ;;  %v993_v17 = vsel %vm987_vm11, %v980_v11, 920167782  ;;  %v1116_v19 = vadd.s32 %v1115_v49, %v1111_v5  ;;  %v988_v21 = vsel %vm984_vm7, %v968_v2, %v971_v55 }
 0x13c   : > { %v994_v22 = vsel %vm986_vm10, %v977_v7, %v993_v17  ;;  %v997_v24 = vsel %vm987_vm11, %v983_v13, 1326507024  ;;  %v990_v25 = vsel %vm986_vm10, %v974_v59, %v989_v15  ;;  %v1274_v28 = vadd.s32 1, %v2514_v57 }
 0x13d   : > { %v995_v26 = vsel %vm985_vm9, %v992_v14, %v994_v22  ;;  %v998_v27 = vsel %vm986_vm10, %v980_v11, %v997_v24  ;;  %v1117_v29 = vadd.s32 536870912, %v1116_v19  ;;  %v1271_v40 = vand.u32 8388607, %v1264_v52 }
 0x13e   : > { %v999_v31 = vsel %vm985_vm9, %v996_v56, %v998_v27  ;;  %v2565_v34 = vmul.u32.u64.low %v2510_v51, %v995_v26  ;;  %v2566_v37 = vmul.u32.u64.high %v2510_v51, %v995_v26, %v2565_v34  ;;  %vm1275_vm12 = vcmp.gt.s32.totalorder %v1274_v28, 0 }
 0x13f   : > { %v2570_v38 = vmul.u32.u64.low %v2510_v51, %v999_v31  ;;  %v2571_v39 = vmul.u32.u64.high %v2510_v51, %v999_v31, %v2570_v38  ;;  %v1118_v41 = vshrl.u32 %v1117_v29, 30  ;;  %v991_v57 = vsel %vm985_vm9, %v988_v21, %v990_v25 }
 0x140   : > { %v1276_v43 = vsel %vm1275_vm12, %v1274_v28, 0  ;;  %v1010_v55 = vadd.s32 1, %v2566_v37  ;;  %v2580_v59 = vadd.f32 %v2468_v6, %v2504_v48  ;;  %v1007_v61 = vmul.u32 %v2510_v51, %v991_v57 }
 0x141   : > { %v1278_v44 = vand.u32 31, %v1276_v43  ;;  %v1119_v53 = vshll.u32 %v1118_v41, 30  ;;  %vm1009_vm13 = vc.u32 %v2571_v39, %v2565_v34  ;;  %v1272_v63 = vor.u32 8388608, %v1271_v40 }
 0x142   : > { %v1011_v50 = vsel %vm1009_vm13, %v1010_v55, %v2566_v37  ;;  %v1142_v3 = vsub.s32 4, %v1118_v41  ;;  %v1112_v51 = vadd.s32 %v2541_v47, %v2538_v46  ;;  %v1160_v7 = vand.u32 2147483647, %v2580_v59 }
 0x143   : > { %v1279_v2 = vsub.s32 32, %v1278_v44  ;;  %v2585_v45 = vsub.s32 %v1116_v19, %v1119_v53  ;;  %v1012_v4 = vadd.s32 %v1011_v50, %v1007_v61  ;;  %v2599_v11 = vshll.u32 %v1272_v63, 8 }
 0x144   : > { %v1163_v13 = vand.u32 2139095040, %v2580_v59  ;;  %v2603_v49 = vshrl.u32 %v1276_v43, 5  ;;  %v2609_v46 = vsel %vm1058_vm14, %v1142_v3, %v1118_v41  ;;  %v1281_v17 = vshll.u32 %v2270_v54, %v1278_v44 }
 0x145   : > { %v1122_v5 = vsub.s32 0, %v2585_v45  ;;  %v1013_v8 = vadd.s32 536870912, %v1012_v4  ;;  %v1282_v10 = vshrl.u32 %v2271_v58, %v1279_v2  ;;  %v1285_v18 = vshrl.u32 %v2272_v60, %v1279_v2 }
 0x146   : > { %v1288_v15 = vshrl.u32 %v2273_v62, %v1279_v2  ;;  %v1291_v56 = vshrl.u32 %v2274_v1, %v1279_v2  ;;  %v1284_v21 = vshll.u32 %v2271_v58, %v1278_v44  ;;  %v1287_v22 = vshll.u32 %v2272_v60, %v1278_v44 }
 0x147   : > { %v1882_v14 = vmin.u32 %v1122_v5, %v2585_v45  ;;  %v1014_v47 = vshrl.u32 %v1013_v8, 30  ;;  %v1294_v24 = vshrl.u32 %v2275_v9, %v1279_v2  ;;  %v1283_v26 = vor.u32 %v1282_v10, %v1281_v17 }
 0x148   : > { %v1290_v27 = vshll.u32 %v2273_v62, %v1278_v44  ;;  %v1164_v28 = vshrl.u32 %v1163_v13, 23  ;;  %v1286_v31 = vor.u32 %v1285_v18, %v1284_v21  ;;  %v1289_v37 = vor.u32 %v1288_v15, %v1287_v22 }
 0x149   : > { %v1124_v19 = vclz %v1882_v14  ;;  %v1015_v25 = vshll.u32 %v1014_v47, 30  ;;  %v1293_v38 = vshll.u32 %v2274_v1, %v1278_v44  ;;  %v1145_v40 = vsel %vm2591_vm15, 0, %v2609_v46 }
 0x14a   : > { %v1280_v57 = vshrl.u32 %v2270_v54, %v1279_v2  ;;  %v1292_v43 = vor.u32 %v1291_v56, %v1290_v27  ;;  %v1038_v53 = vsub.s32 4, %v1014_v47  ;;  %vm1296_vm2 = vcmp.lt.s32.totalorder %v2603_v49, 1 }
 0x14b   : > { %v1883_v29 = vadd.s32 4294967294, %v1124_v19  ;;  %v2622_v41 = vsub.s32 %v1012_v4, %v1015_v25  ;;  %v1295_v55 = vor.u32 %v1294_v24, %v1293_v38  ;;  %vm1298_vm3 = vcmp.lt.s32.totalorder %v2603_v49, 3 }
 0x14c   : > { %vm1299_vm4 = vcmp.lt.s32.totalorder %v2603_v49, 4  ;;  %vm2631_vm5 = vcmp.le.f32.partialorder %v952_v20, 0.7853982  ;;  %v1304_v4 = vsel %vm1296_vm2, %v1283_v26, %v1286_v31  ;;  %v1308_v13 = vsel %vm1296_vm2, %v1286_v31, %v1289_v37 }
 0x14d   : > { %vm1884_vm1 = vcmp.lt.s32.totalorder %v1883_v29, 0  ;;  %v1018_v63 = vsub.s32 0, %v2622_v41  ;;  %v1301_v2 = vsel %vm1299_vm4, %v1289_v37, 2102212464  ;;  %v1305_v10 = vsel %vm1299_vm4, %v1292_v43, 920167782 }
 0x14e   : > { %v1127_v61 = vsel %vm1884_vm1, 0, %v1883_v29  ;;  %v1306_v20 = vsel %vm1298_vm3, %v1289_v37, %v1305_v10  ;;  %v1309_v15 = vsel %vm1299_vm4, %v1295_v55, 1326507024  ;;  %vm1297_vm6 = vcmp.lt.s32.totalorder %v2603_v49, 2 }
 0x14f   : > { %v1128_v44 = vsub.s32 32, %v1127_v61  ;;  %v1132_v50 = vsub.s32 4294967266, %v1127_v61  ;;  %v1129_v5 = vshll.u32 %v2585_v45, %v1127_v61  ;;  %v1878_v8 = vmin.u32 %v1018_v63, %v2622_v41 }
 0x150   : > { %v1300_v17 = vsel %vm1296_vm2, %v1280_v57, %v1283_v26  ;;  %v1302_v45 = vsel %vm1298_vm3, %v1286_v31, %v1301_v2  ;;  %v1307_v21 = vsel %vm1297_vm6, %v1304_v4, %v1306_v20  ;;  %v1039_v37 = vsel %vm954_vm0, %v1038_v53, %v1014_v47 }
 0x151   : > { %v1130_v14 = vshrl.u32 %v1112_v51, %v1128_v44  ;;  %v1133_v18 = vadd.s32 127, %v1132_v50  ;;  %v1020_v46 = vclz %v1878_v8  ;;  %v1310_v51 = vsel %vm1298_vm3, %v1292_v43, %v1309_v15 }
 0x152   : > { %v1311_v24 = vsel %vm1297_vm6, %v1308_v13, %v1310_v51  ;;  %v2651_v25 = vmul.u32.u64.low %v2599_v11, %v1307_v21  ;;  %v2652_v27 = vmul.u32.u64.high %v2599_v11, %v1307_v21, %v2651_v25  ;;  %v1008_v31 = vadd.s32 %v2565_v34, %v2571_v39 }
 0x153   : > { %v1131_v56 = vor.u32 %v1130_v14, %v1129_v5  ;;  %v1134_v19 = vshll.u32 %v1133_v18, 23  ;;  %v1879_v22 = vadd.s32 4294967294, %v1020_v46  ;;  %v1303_v49 = vsel %vm1297_vm6, %v1300_v17, %v1302_v45 }
 0x154   : > { %v2657_v26 = vmul.u32.u64.low %v2599_v11, %v1311_v24  ;;  %v2658_v38 = vmul.u32.u64.high %v2599_v11, %v1311_v24, %v2657_v26  ;;  %v1885_v57 = vadd.s32 4294967169, %v1164_v28  ;;  %v1149_v61 = vadd.s32 3, %v1145_v40 }
 0x155   : > { %v1135_v29 = vor.u32 4788187, %v1134_v19  ;;  %vm1880_vm7 = vcmp.lt.s32.totalorder %v1879_v22, 0  ;;  %v1138_v55 = vcvt.s32.f32 %v1131_v56  ;;  %v1041_v2 = vsel %vm2631_vm5, 0, %v1039_v37 }
 0x156   : > { %v1023_v63 = vsel %vm1880_vm7, 0, %v1879_v22  ;;  %v1322_v47 = vadd.s32 1, %v2652_v27  ;;  %v1319_v4 = vmul.u32 %v2599_v11, %v1303_v49  ;;  %vm1321_vm8 = vc.u32 %v2658_v38, %v2651_v25 }
 0x157   : > { %v1136_v43 = vand.u32 2147483647, %v1135_v29  ;;  %v1024_v44 = vsub.s32 32, %v1023_v63  ;;  %v1028_v50 = vsub.s32 4294967266, %v1023_v63  ;;  %v1170_v34 = vadd.s32 1, %v1885_v57 }
 0x158   : > { %v1025_v39 = vshll.u32 %v2622_v41, %v1023_v63  ;;  %v1323_v40 = vsel %vm1321_vm8, %v1322_v47, %v2652_v27  ;;  %v1167_v13 = vand.u32 8388607, %v1160_v7  ;;  %v1045_v20 = vadd.s32 3, %v1041_v2 }
 0x159   : > { %v1139_v53 = vmul.f32 %v1138_v55, %v1136_v43  ;;  %v1026_v28 = vshrl.u32 %v1008_v31, %v1024_v44  ;;  %v1029_v5 = vadd.s32 127, %v1028_v50  ;;  %v1324_v10 = vadd.s32 %v1323_v40, %v1319_v4 }
 0x15a   : > { %vm1171_vm9 = vcmp.gt.s32.totalorder %v1170_v34, 0  ;;  %v937_v41 = vmul.f32 %v2494_v33, %v2463_v0  ;;  %v2678_v56 = vand.u32 3, %v1149_v61  ;;  %v1168_v51 = vor.u32 8388608, %v1167_v13 }
 0x15b   : > { %v1140_v8 = vxor.u32 2147483648, %v1139_v53  ;;  %v1027_v14 = vor.u32 %v1026_v28, %v1025_v39  ;;  %v1030_v18 = vshll.u32 %v1029_v5, 23  ;;  %v1172_v15 = vsel %vm1171_vm9, %v1170_v34, 0 }
 0x15c   : > { %v1325_v46 = vadd.s32 536870912, %v1324_v10  ;;  %v1174_v17 = vand.u32 31, %v1172_v15  ;;  %v2682_v29 = vand.u32 3, %v1045_v20  ;;  %v2686_v33 = vadd.f32 %v2468_v6, %v937_v41 }
 0x15d   : > { %v1141_v11 = vsel %vm1058_vm14, %v1140_v8, %v1139_v53  ;;  %v1031_v19 = vor.u32 4788187, %v1030_v18  ;;  %v1034_v27 = vcvt.s32.f32 %v1027_v14  ;;  %v2690_v48 = vmul.f32 %v2496_v35, %v2463_v0 }
 0x15e   : > { %v1144_v45 = vsel %vm2591_vm15, %v2473_v12, %v1141_v11  ;;  %v2680_v21 = vshrl.u32 %v1325_v46, 30  ;;  %v1175_v22 = vsub.s32 32, %v1174_v17  ;;  %v2693_v31 = vadd.s32 %v2651_v25, %v2658_v38 }
 0x15f   : > { %2172 = vcosq.f32 %v1144_v45  ;;  %v1032_v24 = vand.u32 2147483647, %v1031_v19  ;;  %vm1155_vm10 = vcmp.eq.s32.totalorder %v2678_v56, 2  ;;  %v2700_v55 = vshrl.u32 %v1172_v15, 5 }
 0x160   : > { %2174 = vsinq.f32 %v1144_v45  ;;  %v1327_v37 = vshll.u32 %v2680_v21, 30  ;;  %v1178_v49 = vshrl.u32 %v2271_v58, %v1175_v22  ;;  %v1181_v57 = vshrl.u32 %v2272_v60, %v1175_v22 }
 0x161   : > { %v1035_v26 = vmul.f32 %v1034_v27, %v1032_v24  ;;  %v1187_v61 = vshrl.u32 %v2274_v1, %v1175_v22  ;;  %v2703_v63 = vshll.u32 %v1168_v51, 8  ;;  %vm1152_vm11 = vcmp.eq.s32.totalorder %v2678_v56, 0 }
 0x162   : > { %v2698_v43 = vsub.s32 %v1324_v10, %v1327_v37  ;;  %v1177_v25 = vshll.u32 %v2270_v54, %v1174_v17  ;;  %v1180_v38 = vshll.u32 %v2271_v58, %v1174_v17  ;;  %v1184_v44 = vshrl.u32 %v2273_v62, %v1175_v22 }
 0x163   : > { %v1036_v35 = vxor.u32 2147483648, %v1035_v26  ;;  %vm1151_vm12 = vcmp.lt.s32.totalorder %v2678_v56, 2  ;;  %v1183_v2 = vshll.u32 %v2272_v60, %v1174_v17  ;;  %v1186_v47 = vshll.u32 %v2273_v62, %v1174_v17 }
 0x164   : > { %v1330_v50 = vsub.s32 0, %v2698_v43  ;;  %v1472_v53 = vand.u32 2147483647, %v2686_v33  ;;  %vm1148_vm13 = vweird.f32 %v2473_v12  ;;  %v1179_v34 = vor.u32 %v1178_v49, %v1177_v25 }
 0x165   : > { %v1037_v4 = vsel %vm954_vm0, %v1036_v35, %v1035_v26  ;;  %v1182_v39 = vor.u32 %v1181_v57, %v1180_v38  ;;  %v1190_v28 = vshrl.u32 %v2275_v9, %v1175_v22  ;;  %v1188_v8 = vor.u32 %v1187_v61, %v1186_v47 }
 0x166   : > { %v1040_v5 = vsel %vm2631_vm5, %v2476_v16, %v1037_v4  ;;  %v1890_v40 = vmin.u32 %v1330_v50, %v2698_v43  ;;  %v1189_v10 = vshll.u32 %v2274_v1, %v1174_v17  ;;  %v1350_v13 = vsub.s32 4, %v2680_v21 }
 0x167   : > { %2176 = vcosq.f32 %v1040_v5  ;;  %v1176_v14 = vshrl.u32 %v2270_v54, %v1175_v22  ;;  %v1185_v18 = vor.u32 %v1184_v44, %v1183_v2  ;;  %vm1266_vm14 = vcmp.lt.s32.totalorder %v2492_v32, 0 }
 0x168   : > { %2178 = vsinq.f32 %v1040_v5  ;;  %v1332_v15 = vclz %v1890_v40  ;;  %v1191_v11 = vor.u32 %v1190_v28, %v1189_v10  ;;  %vm1192_vm15 = vcmp.lt.s32.totalorder %v2700_v55, 1 }
 0x169   : > { %v2173_v20 = vpop.eup %2172  ;;  %vm1193_vm0 = vcmp.lt.s32.totalorder %v2700_v55, 2  ;;  %vm1195_vm1 = vcmp.lt.s32.totalorder %v2700_v55, 4  ;;  %v1200_v17 = vsel %vm1192_vm15, %v1179_v34, %v1182_v39  ;;  %vm1194_vm2 = vcmp.lt.s32.totalorder %v2700_v55, 3 }
 0x16a   : > { %v2175_v3 = vpop.eup %2174  ;;  %v1156_v46 = vxor.u32 2147483648, %v2173_v20  ;;  %v1891_v45 = vadd.s32 4294967294, %v1332_v15  ;;  %v1201_v19 = vsel %vm1195_vm1, %v1188_v8, 920167782  ;;  %vm2739_vm3 = vcmp.le.f32.partialorder %v1264_v52, 0.7853982 }
 0x16b   : > { %v1153_v41 = vxor.u32 2147483648, %v2175_v3  ;;  %v1197_v24 = vsel %vm1195_vm1, %v1185_v18, 2102212464  ;;  %v1202_v27 = vsel %vm1194_vm2, %v1185_v18, %v1201_v19  ;;  %v1204_v37 = vsel %vm1192_vm15, %v1182_v39, %v1185_v18 }
 0x16c   : > { %v1157_v51 = vsel %vm1155_vm10, %v1156_v46, %v2175_v3  ;;  %vm1892_vm4 = vcmp.lt.s32.totalorder %v1891_v45, 0  ;;  %v1203_v49 = vsel %vm1193_vm0, %v1200_v17, %v1202_v27  ;;  %v1205_v57 = vsel %vm1195_vm1, %v1191_v11, 1326507024 }
 0x16d   : > { %v1154_v26 = vsel %vm1152_vm11, %v2173_v20, %v1153_v41  ;;  %vm1047_vm5 = vcmp.lt.s32.totalorder %v2682_v29, 2  ;;  %v1335_v61 = vsel %vm1892_vm4, 0, %v1891_v45  ;;  %v1196_v35 = vsel %vm1192_vm15, %v1176_v14, %v1179_v34 }
 0x16e   : > { %v1158_v52 = vsel %vm1151_vm12, %v1154_v26, %v1157_v51  ;;  %v1206_v25 = vsel %vm1194_vm2, %v1188_v8, %v1205_v57  ;;  %vm1044_vm6 = vweird.f32 %v2476_v16  ;;  %v1336_v44 = vsub.s32 32, %v1335_v61 }
 0x16f   : > { %v1159_v38 = vsel %vm1148_vm13, nan, %v1158_v52  ;;  %v1340_v50 = vsub.s32 4294967266, %v1335_v61  ;;  %v1198_v56 = vsel %vm1194_vm2, %v1182_v39, %v1197_v24  ;;  %v1337_v2 = vshll.u32 %v2698_v43, %v1335_v61 }
 0x170   : > { %1785 = vst [vmem:[%s2763_s6 + $0x8] sm:$0xff] %v1159_v38  ;;  %v1207_v47 = vsel %vm1193_vm0, %v1204_v37, %v1206_v25  ;;  %v2770_v4 = vmul.u32.u64.low %v2703_v63, %v1203_v49  ;;  %v2771_v12 = vmul.u32.u64.high %v2703_v63, %v1203_v49, %v2770_v4  ;;  %v1338_v34 = vshrl.u32 %v2693_v31, %v1336_v44 }
 0x171   : > { %v1341_v28 = vadd.s32 127, %v1340_v50  ;;  %v2775_v5 = vmul.u32.u64.low %v2703_v63, %v1207_v47  ;;  %v2776_v40 = vmul.u32.u64.high %v2703_v63, %v1207_v47, %v2775_v5  ;;  %v2177_v39 = vpop.eup %2176  ;;  %vm1048_vm7 = vcmp.eq.s32.totalorder %v2682_v29, 0 }
 0x172   : > { %vm1051_vm8 = vcmp.eq.s32.totalorder %v2682_v29, 2  ;;  %v1351_v43 = vsel %vm1266_vm14, %v1350_v13, %v2680_v21  ;;  %v1475_v8 = vand.u32 2139095040, %v2686_v33  ;;  %v2179_v10 = vpop.eup %2178  ;;  %v1052_v14 = vxor.u32 2147483648, %v2177_v39 }
 0x173   : > { %v1339_v18 = vor.u32 %v1338_v34, %v1337_v2  ;;  %v1342_v31 = vshll.u32 %v1341_v28, 23  ;;  %v1199_v20 = vsel %vm1193_vm0, %v1196_v35, %v1198_v56  ;;  %v1049_v15 = vxor.u32 2147483648, %v2179_v10 }
 0x174   : > { %v1218_v11 = vadd.s32 1, %v2771_v12  ;;  %v1476_v3 = vshrl.u32 %v1475_v8, 23  ;;  %v2789_v46 = vadd.f32 %v2468_v6, %v2690_v48  ;;  %v1053_v17 = vsel %vm1051_vm8, %v1052_v14, %v2179_v10 }
 0x175   : > { %v1343_v21 = vor.u32 4788187, %v1342_v31  ;;  %v1353_v13 = vsel %vm2739_vm3, 0, %v1351_v43  ;;  %v1479_v41 = vand.u32 8388607, %v1472_v53  ;;  %v1050_v55 = vsel %vm1048_vm7, %v2177_v39, %v1049_v15 }
 0x176   : > { %v1215_v45 = vmul.u32 %v2703_v63, %v1199_v20  ;;  %vm1217_vm9 = vc.u32 %v2776_v40, %v2770_v4  ;;  %v1897_v19 = vadd.s32 4294967169, %v1476_v3  ;;  %v1054_v48 = vsel %vm1047_vm5, %v1050_v55, %v1053_v17 }
 0x177   : > { %v1344_v51 = vand.u32 2147483647, %v1343_v21  ;;  %v1346_v24 = vcvt.s32.f32 %v1339_v18  ;;  %v1219_v27 = vsel %vm1217_vm9, %v1218_v11, %v2771_v12  ;;  %v1055_v37 = vsel %vm1044_vm6, nan, %v1054_v48 }
 0x178   : > { %v1220_v26 = vadd.s32 %v1219_v27, %v1215_v45  ;;  %v1482_v49 = vadd.s32 1, %v1897_v19  ;;  %1784 = vst [vmem:[%s2763_s6] sm:$0xff] %v1055_v37  ;;  %v1357_v52 = vadd.s32 3, %v1353_v13  ;;  %v1480_v61 = vor.u32 8388608, %v1479_v41 }
 0x179   : > { %v1347_v57 = vmul.f32 %v1346_v24, %v1344_v51  ;;  %v2059_v35 = vadd.f32 %v2482_v23, %v2498_v36  ;;  %v2809_v29 = vadd.f32 %v2489_v30, %v2501_v42  ;;  %v1368_v16 = vand.u32 2147483647, %v2789_v46 }
 0x17a   : > { %v1221_v63 = vadd.s32 536870912, %v1220_v26  ;;  %vm1483_vm10 = vcmp.gt.s32.totalorder %v1482_v49, 0  ;;  %v1371_v44 = vand.u32 2139095040, %v2789_v46  ;;  %vm2815_vm11 = vcmp.le.f32.partialorder %v1160_v7, 0.7853982 }
 0x17b   : > { %v1348_v25 = vxor.u32 2147483648, %v1347_v57  ;;  %v1484_v38 = vsel %vm1483_vm10, %v1482_v49, 0  ;;  %vm1162_vm12 = vcmp.lt.s32.totalorder %v2580_v59, 0  ;;  %v2822_v36 = vand.u32 3, %v1357_v52 }
 0x17c   : > { %v1222_v56 = vshrl.u32 %v1221_v63, 30  ;;  %v1486_v23 = vand.u32 31, %v1484_v38  ;;  %v2825_v42 = vadd.s32 %v2770_v4, %v2776_v40  ;;  %v2827_v2 = vshll.u32 %v1480_v61, 8 }
 0x17d   : > { %v1349_v30 = vsel %vm1266_vm14, %v1348_v25, %v1347_v57  ;;  %v1485_v28 = vshrl.u32 %v1484_v38, 5  ;;  %v1372_v5 = vshrl.u32 %v1371_v44, 23  ;;  %v2834_v39 = vand.u32 8388607, %v1368_v16 }
 0x17e   : > { %v1352_v7 = vsel %vm2739_vm3, %v2492_v32, %v1349_v30  ;;  %v1223_v47 = vshll.u32 %v1222_v56, 30  ;;  %v1246_v12 = vsub.s32 4, %v1222_v56  ;;  %v1487_v34 = vsub.s32 32, %v1486_v23 }
 0x17f   : > { %2180 = vcosq.f32 %v1352_v7  ;;  %v1489_v4 = vshll.u32 %v2270_v54, %v1486_v23  ;;  %v1492_v40 = vshll.u32 %v2271_v58, %v1486_v23  ;;  %v1495_v10 = vshll.u32 %v2272_v60, %v1486_v23 }
 0x180   : > { %2182 = vsinq.f32 %v1352_v7  ;;  %v2836_v43 = vsub.s32 %v1220_v26, %v1223_v47  ;;  %v1490_v22 = vshrl.u32 %v2271_v58, %v1487_v34  ;;  %v1493_v8 = vshrl.u32 %v2272_v60, %v1487_v34 }
 0x181   : > { %v1496_v14 = vshrl.u32 %v2273_v62, %v1487_v34  ;;  %v2847_v31 = vsel %vm1162_vm12, %v1246_v12, %v1222_v56  ;;  %v1498_v20 = vshll.u32 %v2273_v62, %v1486_v23  ;;  %v1499_v15 = vshrl.u32 %v2274_v1, %v1487_v34 }
 0x182   : > { %v1226_v18 = vsub.s32 0, %v2836_v43  ;;  %vm1363_vm13 = vcmp.eq.s32.totalorder %v2822_v36, 2  ;;  %v1491_v11 = vor.u32 %v1490_v22, %v1489_v4  ;;  %v1494_v3 = vor.u32 %v1493_v8, %v1492_v40 }
 0x183   : > { %v1497_v17 = vor.u32 %v1496_v14, %v1495_v10  ;;  %v1376_v21 = vor.u32 8388608, %v2834_v39  ;;  %vm1360_vm14 = vcmp.eq.s32.totalorder %v2822_v36, 0  ;;  %v1500_v41 = vor.u32 %v1499_v15, %v1498_v20 }
 0x184   : > { %v1886_v13 = vmin.u32 %v1226_v18, %v2836_v43  ;;  %v1502_v55 = vshrl.u32 %v2275_v9, %v1487_v34  ;;  %v939_v45 = vmul.f32 %v2059_v35, %v2463_v0  ;;  %vm1359_vm15 = vcmp.lt.s32.totalorder %v2822_v36, 2 }
 0x185   : > { %v1249_v19 = vsel %vm2815_vm11, 0, %v2847_v31  ;;  %v1488_v48 = vshrl.u32 %v2270_v54, %v1487_v34  ;;  %v1501_v51 = vshll.u32 %v2274_v1, %v1486_v23  ;;  %v1893_v24 = vadd.s32 4294967169, %v1372_v5 }
 0x186   : > { %vm1356_vm0 = vweird.f32 %v2492_v32  ;;  %v1228_v27 = vclz %v1886_v13  ;;  %vm1504_vm1 = vcmp.lt.s32.totalorder %v1485_v28, 1  ;;  %vm1506_vm2 = vcmp.lt.s32.totalorder %v1485_v28, 3 }
 0x187   : > { %vm1507_vm3 = vcmp.lt.s32.totalorder %v1485_v28, 4  ;;  %v1503_v37 = vor.u32 %v1502_v55, %v1501_v51  ;;  %v1508_v26 = vsel %vm1504_vm1, %v1488_v48, %v1491_v11  ;;  %v1512_v49 = vsel %vm1504_vm1, %v1491_v11, %v1494_v3 }
 0x188   : > { %v1509_v0 = vsel %vm1507_vm3, %v1497_v17, 2102212464  ;;  %v1887_v57 = vadd.s32 4294967294, %v1228_v27  ;;  %v1513_v61 = vsel %vm1507_vm3, %v1500_v41, 920167782  ;;  %v1516_v63 = vsel %vm1504_vm1, %v1494_v3, %v1497_v17 }
 0x189   : > { %v1510_v52 = vsel %vm1506_vm2, %v1494_v3, %v1509_v0  ;;  %v2181_v35 = vpop.eup %2180  ;;  %vm1505_vm4 = vcmp.lt.s32.totalorder %v1485_v28, 2  ;;  %v1514_v25 = vsel %vm1506_vm2, %v1497_v17, %v1513_v61  ;;  %v1517_v38 = vsel %vm1507_vm3, %v1503_v37, 1326507024 }
 0x18a   : > { %v1378_v44 = vadd.s32 1, %v1893_v24  ;;  %v2183_v56 = vpop.eup %2182  ;;  %v1364_v23 = vxor.u32 2147483648, %v2181_v35  ;;  %vm1888_vm5 = vcmp.lt.s32.totalorder %v1887_v57, 0  ;;  %v1511_v30 = vsel %vm1505_vm4, %v1508_v26, %v1510_v52 }
 0x18b   : > { %v1518_v7 = vsel %vm1506_vm2, %v1500_v41, %v1517_v38  ;;  %v1361_v47 = vxor.u32 2147483648, %v2183_v56  ;;  %v1231_v12 = vsel %vm1888_vm5, 0, %v1887_v57  ;;  %v1515_v34 = vsel %vm1505_vm4, %v1512_v49, %v1514_v25 }
 0x18c   : > { %v1519_v5 = vsel %vm1505_vm4, %v1516_v63, %v1518_v7  ;;  %v1365_v39 = vsel %vm1363_vm13, %v1364_v23, %v2183_v56  ;;  %v1232_v4 = vsub.s32 32, %v1231_v12  ;;  %v1233_v40 = vshll.u32 %v2836_v43, %v1231_v12 }
 0x18d   : > { %v1236_v22 = vsub.s32 4294967266, %v1231_v12  ;;  %v1362_v8 = vsel %vm1360_vm14, %v2181_v35, %v1361_v47  ;;  %v2873_v10 = vmul.u32.u64.low %v2827_v2, %v1519_v5  ;;  %v2874_v14 = vmul.u32.u64.high %v2827_v2, %v1519_v5, %v2873_v10 }
 0x18e   : > { %vm1379_vm6 = vcmp.gt.s32.totalorder %v1378_v44, 0  ;;  %v1366_v28 = vsel %vm1359_vm15, %v1362_v8, %v1365_v39  ;;  %v1234_v18 = vshrl.u32 %v2825_v42, %v1232_v4  ;;  %v1253_v41 = vadd.s32 3, %v1249_v19 }
 0x18f   : > { %v1237_v31 = vadd.s32 127, %v1236_v22  ;;  %v1380_v20 = vsel %vm1379_vm6, %v1378_v44, 0  ;;  %v1367_v15 = vsel %vm1356_vm0, nan, %v1366_v28  ;;  %v1527_v36 = vmul.u32 %v2827_v2, %v1511_v30 }
 0x190   : > { %v2882_v43 = vmul.u32.u64.low %v2827_v2, %v1515_v34  ;;  %v2883_v11 = vmul.u32.u64.high %v2827_v2, %v1515_v34, %v2882_v43  ;;  %1787 = vst [vmem:[%s2763_s6 + $0x18] sm:$0xff] %v1367_v15  ;;  %v1235_v3 = vor.u32 %v1234_v18, %v1233_v40  ;;  %v1382_v13 = vand.u32 31, %v1380_v20 }
 0x191   : > { %v1238_v17 = vshll.u32 %v1237_v31, 23  ;;  %v2888_v55 = vshrl.u32 %v1380_v20, 5  ;;  %v2890_v42 = vshll.u32 %v1376_v21, 8  ;;  %v2895_v51 = vadd.f32 %v2468_v6, %v939_v45 }
 0x192   : > { %vm1529_vm7 = vc.u32 %v2874_v14, %v2882_v43  ;;  %v1383_v32 = vsub.s32 32, %v1382_v13  ;;  %v1242_v24 = vcvt.s32.f32 %v1235_v3  ;;  %v1530_v27 = vadd.s32 1, %v2883_v11 }
 0x193   : > { %v1239_v48 = vor.u32 4788187, %v1238_v17  ;;  %v1385_v37 = vshll.u32 %v2270_v54, %v1382_v13  ;;  %v1388_v19 = vshll.u32 %v2271_v58, %v1382_v13  ;;  %v1391_v0 = vshll.u32 %v2272_v60, %v1382_v13 }
 0x194   : > { %v1386_v26 = vshrl.u32 %v2271_v58, %v1383_v32  ;;  %v1389_v21 = vshrl.u32 %v2272_v60, %v1383_v32  ;;  %v1531_v49 = vsel %vm1529_vm7, %v1530_v27, %v2883_v11  ;;  %v1392_v57 = vshrl.u32 %v2273_v62, %v1383_v32 }
 0x195   : > { %v1240_v2 = vand.u32 2147483647, %v1239_v48  ;;  %v1394_v6 = vshll.u32 %v2273_v62, %v1382_v13  ;;  %v1395_v45 = vshrl.u32 %v2274_v1, %v1383_v32  ;;  %v1532_v61 = vadd.s32 %v1531_v49, %v1527_v36 }
 0x196   : > { %v1387_v63 = vor.u32 %v1386_v26, %v1385_v37  ;;  %v1390_v35 = vor.u32 %v1389_v21, %v1388_v19  ;;  %v1393_v25 = vor.u32 %v1392_v57, %v1391_v0  ;;  %v1397_v44 = vshll.u32 %v2274_v1, %v1382_v13 }
 0x197   : > { %v1243_v52 = vmul.f32 %v1242_v24, %v1240_v2  ;;  %v1396_v38 = vor.u32 %v1395_v45, %v1394_v6  ;;  %v1398_v56 = vshrl.u32 %v2275_v9, %v1383_v32  ;;  %v1533_v30 = vadd.s32 536870912, %v1532_v61 }
 0x198   : > { %vm1400_vm8 = vcmp.lt.s32.totalorder %v2888_v55, 1  ;;  %vm1403_vm9 = vcmp.lt.s32.totalorder %v2888_v55, 4  ;;  %vm1402_vm10 = vcmp.lt.s32.totalorder %v2888_v55, 3  ;;  %vm1401_vm13 = vcmp.lt.s32.totalorder %v2888_v55, 2 }
 0x199   : > { %v1244_v23 = vxor.u32 2147483648, %v1243_v52  ;;  %v1399_v7 = vor.u32 %v1398_v56, %v1397_v44  ;;  %v1408_v47 = vsel %vm1400_vm8, %v1387_v63, %v1390_v35  ;;  %v1409_v12 = vsel %vm1403_vm9, %v1396_v38, 920167782 }
 0x19a   : > { %v1534_v5 = vshrl.u32 %v1533_v30, 30  ;;  %v1410_v39 = vsel %vm1402_vm10, %v1393_v25, %v1409_v12  ;;  %v1405_v40 = vsel %vm1403_vm9, %v1393_v25, 2102212464  ;;  %v1412_v8 = vsel %vm1400_vm8, %v1390_v35, %v1393_v25 }
 0x19b   : > { %v1245_v34 = vsel %vm1162_vm12, %v1244_v23, %v1243_v52  ;;  %v1411_v22 = vsel %vm1401_vm13, %v1408_v47, %v1410_v39  ;;  %v1384_v28 = vshrl.u32 %v2270_v54, %v1383_v32  ;;  %v1413_v18 = vsel %vm1403_vm9, %v1399_v7, 1326507024  ;;  %v2204_v32 = vld [vmem:[%s3224_s0 + $0x8] ss:$0 sm:$0xff] }
 0x19c   : > { %v1248_v4 = vsel %vm2815_vm11, %v2580_v59, %v1245_v34  ;;  %v1535_v10 = vshll.u32 %v1534_v5, 30  ;;  %v1414_v50 = vsel %vm1402_vm10, %v1396_v38, %v1413_v18  ;;  %v1406_v3 = vsel %vm1402_vm10, %v1390_v35, %v1405_v40 }
 0x19d   : > { %2184 = vcosq.f32 %v1248_v4  ;;  %v2936_v31 = vmul.u32.u64.low %v2890_v42, %v1411_v22  ;;  %v2937_v20 = vmul.u32.u64.high %v2890_v42, %v1411_v22, %v2936_v31  ;;  %v1404_v11 = vsel %vm1400_vm8, %v1384_v28, %v1387_v63 }
 0x19e   : > { %2186 = vsinq.f32 %v1248_v4  ;;  %v2940_v15 = vsub.s32 %v1532_v61, %v1535_v10  ;;  %v1415_v17 = vsel %vm1401_vm13, %v1412_v8, %v1414_v50  ;;  %v1558_v13 = vsub.s32 4, %v1534_v5 }
 0x19f   : > { %v2949_v36 = vmul.u32.u64.low %v2890_v42, %v1415_v17  ;;  %v2950_v48 = vmul.u32.u64.high %v2890_v42, %v1415_v17, %v2949_v36  ;;  %v938_v24 = vmul.f32 %v2204_v32, %v2809_v29  ;;  %v1683_v37 = vand.u32 2139095040, %v2895_v51 }
 0x1a0   : > { %v1538_v27 = vsub.s32 0, %v2940_v15  ;;  %v1254_v19 = vand.u32 3, %v1253_v41  ;;  %v1407_v2 = vsel %vm1401_vm13, %v1404_v11, %v1406_v3  ;;  %v1426_v26 = vadd.s32 1, %v2937_v20  ;;  %v2205_v41 = vld [vmem:[%s3224_s0 + $0x9] ss:$0 sm:$0xff] }
 0x1a1   : > { %vm1474_vm11 = vcmp.lt.s32.totalorder %v2686_v33, 0  ;;  %v1680_v0 = vand.u32 2147483647, %v2895_v51  ;;  %v1684_v49 = vshrl.u32 %v1683_v37, 23  ;;  %vm1425_vm12 = vc.u32 %v2950_v48, %v2936_v31 }
 0x1a2   : > { %v1898_v21 = vmin.u32 %v1538_v27, %v2940_v15  ;;  %v1559_v29 = vsel %vm1474_vm11, %v1558_v13, %v1534_v5  ;;  %v2971_v55 = vadd.f32 %v2205_v41, %v938_v24  ;;  %vm1252_vm14 = vweird.f32 %v2580_v59 }
 0x1a3   : > { %vm2976_vm15 = vcmp.le.f32.partialorder %v1472_v53, 0.7853982  ;;  %v1423_v45 = vmul.u32 %v2890_v42, %v1407_v2  ;;  %vm1255_vm0 = vcmp.lt.s32.totalorder %v1254_v19, 2  ;;  %vm1256_vm1 = vcmp.eq.s32.totalorder %v1254_v19, 0 }
 0x1a4   : > { %v1540_v6 = vclz %v1898_v21  ;;  %v1427_v52 = vsel %vm1425_vm12, %v1426_v26, %v2937_v20  ;;  %v1905_v61 = vadd.s32 4294967169, %v1684_v49  ;;  %v1561_v25 = vsel %vm2976_vm15, 0, %v1559_v29 }
 0x1a5   : > { %v1428_v38 = vadd.s32 %v1427_v52, %v1423_v45  ;;  %v1687_v53 = vand.u32 8388607, %v1680_v0  ;;  %vm1259_vm2 = vcmp.eq.s32.totalorder %v1254_v19, 2  ;;  %v1579_v42 = vand.u32 2139095040, %v2971_v55 }
 0x1a6   : > { %v1899_v35 = vadd.s32 4294967294, %v1540_v6  ;;  %v1690_v23 = vadd.s32 1, %v1905_v61  ;;  %v1528_v7 = vadd.s32 %v2882_v43, %v2874_v14  ;;  %v1565_v5 = vadd.s32 3, %v1561_v25 }
 0x1a7   : > { %v2185_v63 = vpop.eup %2184  ;;  %v1429_v47 = vadd.s32 536870912, %v1428_v38  ;;  %v1688_v22 = vor.u32 8388608, %v1687_v53  ;;  %v1580_v18 = vshrl.u32 %v1579_v42, 23  ;;  %v1424_v32 = vadd.s32 %v2936_v31, %v2950_v48 }
 0x1a8   : > { %v2187_v44 = vpop.eup %2186  ;;  %v1260_v56 = vxor.u32 2147483648, %v2185_v63  ;;  %vm1900_vm3 = vcmp.lt.s32.totalorder %v1899_v35, 0  ;;  %vm1691_vm4 = vcmp.gt.s32.totalorder %v1690_v23, 0  ;;  %v2998_v36 = vand.u32 3, %v1565_v5 }
 0x1a9   : > { %v1257_v30 = vxor.u32 2147483648, %v2187_v44  ;;  %v1543_v34 = vsel %vm1900_vm3, 0, %v1899_v35  ;;  %v2991_v10 = vshrl.u32 %v1429_v47, 30  ;;  %v1692_v28 = vsel %vm1691_vm4, %v1690_v23, 0 }
 0x1aa   : > { %v1261_v12 = vsel %vm1259_vm2, %v1260_v56, %v2187_v44  ;;  %v1544_v4 = vsub.s32 32, %v1543_v34  ;;  %v1548_v40 = vsub.s32 4294967266, %v1543_v34  ;;  %v1545_v43 = vshll.u32 %v2940_v15, %v1543_v34 }
 0x1ab   : > { %v1258_v39 = vsel %vm1256_vm1, %v2185_v63, %v1257_v30  ;;  %v1431_v11 = vshll.u32 %v2991_v10, 30  ;;  %v1694_v3 = vand.u32 31, %v1692_v28  ;;  %v1901_v59 = vadd.s32 4294967169, %v1580_v18 }
 0x1ac   : > { %v1262_v8 = vsel %vm1255_vm0, %v1258_v39, %v1261_v12  ;;  %v1546_v50 = vshrl.u32 %v1528_v7, %v1544_v4  ;;  %v1549_v20 = vadd.s32 127, %v1548_v40  ;;  %v3004_v19 = vshrl.u32 %v1692_v28, 5 }
 0x1ad   : > { %v1263_v14 = vsel %vm1252_vm14, nan, %v1262_v8  ;;  %v3002_v24 = vsub.s32 %v1428_v38, %v1431_v11  ;;  %v1695_v27 = vsub.s32 32, %v1694_v3  ;;  %v3006_v15 = vshll.u32 %v1688_v22, 8 }
 0x1ae   : > { %1786 = vst [vmem:[%s2763_s6 + $0x10] sm:$0xff] %v1263_v14  ;;  %v1547_v17 = vor.u32 %v1546_v50, %v1545_v43  ;;  %v1550_v13 = vshll.u32 %v1549_v20, 23  ;;  %v1576_v2 = vand.u32 2147483647, %v2971_v55  ;;  %v1454_v49 = vsub.s32 4, %v2991_v10 }
 0x1af   : > { %v1434_v21 = vsub.s32 0, %v3002_v24  ;;  %v1698_v29 = vshrl.u32 %v2271_v58, %v1695_v27  ;;  %v1701_v31 = vshrl.u32 %v2272_v60, %v1695_v27  ;;  %v1703_v48 = vshll.u32 %v2272_v60, %v1694_v3 }
 0x1b0   : > { %v1551_v37 = vor.u32 4788187, %v1550_v13  ;;  %v1554_v26 = vcvt.s32.f32 %v1547_v17  ;;  %v1704_v6 = vshrl.u32 %v2273_v62, %v1695_v27  ;;  %v1697_v52 = vshll.u32 %v2270_v54, %v1694_v3 }
 0x1b1   : > { %v1894_v45 = vmin.u32 %v1434_v21, %v3002_v24  ;;  %v1700_v61 = vshll.u32 %v2271_v58, %v1694_v3  ;;  %v1586_v63 = vadd.s32 1, %v1901_v59  ;;  %v1706_v38 = vshll.u32 %v2273_v62, %v1694_v3 }
 0x1b2   : > { %v1552_v41 = vand.u32 2147483647, %v1551_v37  ;;  %v1705_v25 = vor.u32 %v1704_v6, %v1703_v48  ;;  %v1707_v53 = vshrl.u32 %v2274_v1, %v1695_v27  ;;  %v1699_v56 = vor.u32 %v1698_v29, %v1697_v52 }
 0x1b3   : > { %v1436_v44 = vclz %v1894_v45  ;;  %v1702_v23 = vor.u32 %v1701_v31, %v1700_v61  ;;  %vm1712_vm5 = vcmp.lt.s32.totalorder %v3004_v19, 1  ;;  %v1709_v7 = vshll.u32 %v2274_v1, %v1694_v3 }
 0x1b4   : > { %v1555_v35 = vmul.f32 %v1554_v26, %v1552_v41  ;;  %v1708_v30 = vor.u32 %v1707_v53, %v1706_v38  ;;  %v1710_v47 = vshrl.u32 %v2275_v9, %v1695_v27  ;;  %v1696_v34 = vshrl.u32 %v2270_v54, %v1695_v27 }
 0x1b5   : > { %v1895_v12 = vadd.s32 4294967294, %v1436_v44  ;;  %vm1713_vm6 = vcmp.lt.s32.totalorder %v3004_v19, 2  ;;  %vm1715_vm7 = vcmp.lt.s32.totalorder %v3004_v19, 4  ;;  %vm1714_vm8 = vcmp.lt.s32.totalorder %v3004_v19, 3 }
 0x1b6   : > { %v1556_v42 = vxor.u32 2147483648, %v1555_v35  ;;  %v1711_v39 = vor.u32 %v1710_v47, %v1709_v7  ;;  %v1717_v4 = vsel %vm1715_vm7, %v1705_v25, 2102212464  ;;  %v1720_v22 = vsel %vm1712_vm5, %v1699_v56, %v1702_v23 }
 0x1b7   : > { %vm1896_vm9 = vcmp.lt.s32.totalorder %v1895_v12, 0  ;;  %v1721_v8 = vsel %vm1715_vm7, %v1708_v30, 920167782  ;;  %v1716_v18 = vsel %vm1712_vm5, %v1696_v34, %v1699_v56  ;;  %v1718_v57 = vsel %vm1714_vm8, %v1702_v23, %v1717_v4 }
 0x1b8   : > { %v1557_v5 = vsel %vm1474_vm11, %v1556_v42, %v1555_v35  ;;  %v1439_v28 = vsel %vm1896_vm9, 0, %v1895_v12  ;;  %v1722_v14 = vsel %vm1714_vm8, %v1705_v25, %v1721_v8  ;;  %v1724_v3 = vsel %vm1712_vm5, %v1702_v23, %v1705_v25 }
 0x1b9   : > { %v1560_v40 = vsel %vm2976_vm15, %v2686_v33, %v1557_v5  ;;  %v1440_v43 = vsub.s32 32, %v1439_v28  ;;  %v1444_v50 = vsub.s32 4294967266, %v1439_v28  ;;  %v1441_v20 = vshll.u32 %v3002_v24, %v1439_v28 }
 0x1ba   : > { %2188 = vcosq.f32 %v1560_v40  ;;  %v1723_v11 = vsel %vm1713_vm6, %v1720_v22, %v1722_v14  ;;  %v1725_v17 = vsel %vm1715_vm7, %v1711_v39, 1326507024  ;;  %vm1587_vm10 = vcmp.gt.s32.totalorder %v1586_v63, 0 }
 0x1bb   : > { %2190 = vsinq.f32 %v1560_v40  ;;  %v1442_v13 = vshrl.u32 %v1424_v32, %v1440_v43  ;;  %v1445_v27 = vadd.s32 127, %v1444_v50  ;;  %v1726_v59 = vsel %vm1714_vm8, %v1708_v30, %v1725_v17 }
 0x1bc   : > { %v1727_v37 = vsel %vm1713_vm6, %v1724_v3, %v1726_v59  ;;  %v3056_v24 = vmul.u32.u64.low %v3006_v15, %v1723_v11  ;;  %v3057_v26 = vmul.u32.u64.high %v3006_v15, %v1723_v11, %v3056_v24  ;;  %v1588_v21 = vsel %vm1587_vm10, %v1586_v63, 0 }
 0x1bd   : > { %v1443_v29 = vor.u32 %v1442_v13, %v1441_v20  ;;  %v1446_v41 = vshll.u32 %v1445_v27, 23  ;;  %v3061_v31 = vmul.u32.u64.low %v3006_v15, %v1727_v37  ;;  %v3062_v48 = vmul.u32.u64.high %v3006_v15, %v1727_v37, %v3061_v31 }
 0x1be   : > { %vm1370_vm13 = vcmp.lt.s32.totalorder %v2789_v46, 0  ;;  %v1719_v32 = vsel %vm1713_vm6, %v1716_v18, %v1718_v57  ;;  %v1590_v6 = vand.u32 31, %v1588_v21  ;;  %vm1564_vm11 = vweird.f32 %v2686_v33 }
 0x1bf   : > { %vm1567_vm12 = vcmp.lt.s32.totalorder %v2998_v36, 2  ;;  %vm1568_vm14 = vcmp.eq.s32.totalorder %v2998_v36, 0  ;;  %vm1571_vm15 = vcmp.eq.s32.totalorder %v2998_v36, 2  ;;  %vm3073_vm0 = vcmp.le.f32.partialorder %v1368_v16, 0.7853982 }
 0x1c0   : > { %v1447_v52 = vor.u32 4788187, %v1446_v41  ;;  %v1455_v19 = vsel %vm1370_vm13, %v1454_v49, %v2991_v10  ;;  %v1738_v61 = vadd.s32 1, %v3057_v26  ;;  %v1583_v63 = vand.u32 8388607, %v1576_v2 }
 0x1c1   : > { %v1591_v35 = vsub.s32 32, %v1590_v6  ;;  %v1450_v38 = vcvt.s32.f32 %v1443_v29  ;;  %v1735_v16 = vmul.u32 %v3006_v15, %v1719_v32  ;;  %vm1737_vm1 = vc.u32 %v3062_v48, %v3056_v24 }
 0x1c2   : > { %v1448_v25 = vand.u32 2147483647, %v1447_v52  ;;  %v1739_v44 = vsel %vm1737_vm1, %v1738_v61, %v3057_v26  ;;  %v3089_v56 = vshrl.u32 %v1588_v21, 5  ;;  %v1593_v10 = vshll.u32 %v2270_v54, %v1590_v6 }
 0x1c3   : > { %v1594_v49 = vshrl.u32 %v2271_v58, %v1591_v35  ;;  %v1740_v7 = vadd.s32 %v1739_v44, %v1735_v16  ;;  %v1597_v47 = vshrl.u32 %v2272_v60, %v1591_v35  ;;  %v1596_v15 = vshll.u32 %v2271_v58, %v1590_v6 }
 0x1c4   : > { %v2189_v53 = vpop.eup %2188  ;;  %v1451_v30 = vmul.f32 %v1450_v38, %v1448_v25  ;;  %v1599_v34 = vshll.u32 %v2272_v60, %v1590_v6  ;;  %v1600_v5 = vshrl.u32 %v2273_v62, %v1591_v35  ;;  %v1602_v28 = vshll.u32 %v2273_v62, %v1590_v6 }
 0x1c5   : > { %v2191_v23 = vpop.eup %2190  ;;  %v1572_v42 = vxor.u32 2147483648, %v2189_v53  ;;  %v1741_v40 = vadd.s32 536870912, %v1740_v7  ;;  %v1595_v22 = vor.u32 %v1594_v49, %v1593_v10  ;;  %v1603_v18 = vshrl.u32 %v2274_v1, %v1591_v35 }
 0x1c6   : > { %v1569_v12 = vxor.u32 2147483648, %v2191_v23  ;;  %v1452_v4 = vxor.u32 2147483648, %v1451_v30  ;;  %v1606_v58 = vshrl.u32 %v2275_v9, %v1591_v35  ;;  %v1598_v50 = vor.u32 %v1597_v47, %v1596_v15 }
 0x1c7   : > { %v1573_v39 = vsel %vm1571_vm15, %v1572_v42, %v2191_v23  ;;  %v3108_v43 = vshrl.u32 %v1741_v40, 30  ;;  %v1604_v20 = vor.u32 %v1603_v18, %v1602_v28  ;;  %v1605_v11 = vshll.u32 %v2274_v1, %v1590_v6 }
 0x1c8   : > { %v1570_v8 = vsel %vm1568_vm14, %v2189_v53, %v1569_v12  ;;  %v1453_v14 = vsel %vm1370_vm13, %v1452_v4, %v1451_v30  ;;  %v1457_v9 = vsel %vm3073_vm0, 0, %v1455_v19  ;;  %v1601_v3 = vor.u32 %v1600_v5, %v1599_v34 }
 0x1c9   : > { %v1574_v60 = vsel %vm1567_vm12, %v1570_v8, %v1573_v39  ;;  %v1456_v62 = vsel %vm3073_vm0, %v2789_v46, %v1453_v14  ;;  %v1743_v36 = vshll.u32 %v3108_v43, 30  ;;  %v1584_v17 = vor.u32 8388608, %v1583_v63 }
 0x1ca   : > { %v1575_v57 = vsel %vm1564_vm11, nan, %v1574_v60  ;;  %2192 = vcosq.f32 %v1456_v62  ;;  %v1607_v13 = vor.u32 %v1606_v58, %v1605_v11  ;;  %vm1608_vm2 = vcmp.lt.s32.totalorder %v3089_v56, 1 }
 0x1cb   : > { %1789 = vst [vmem:[%s2763_s6 + $0x28] sm:$0xff] %v1575_v57  ;;  %2194 = vsinq.f32 %v1456_v62  ;;  %v1744_v33 = vsub.s32 %v1740_v7, %v1743_v36  ;;  %vm1611_vm3 = vcmp.lt.s32.totalorder %v3089_v56, 4  ;;  %v1616_v27 = vsel %vm1608_vm2, %v1595_v22, %v1598_v50 }
 0x1cc   : > { %v1461_v1 = vadd.s32 3, %v1457_v9  ;;  %vm1610_vm4 = vcmp.lt.s32.totalorder %v3089_v56, 3  ;;  %v1617_v59 = vsel %vm1611_vm3, %v1604_v20, 920167782  ;;  %vm1609_vm5 = vcmp.lt.s32.totalorder %v3089_v56, 2 }
 0x1cd   : > { %v1746_v37 = vsub.s32 0, %v1744_v33  ;;  %v1618_v26 = vsel %vm1610_vm4, %v1601_v3, %v1617_v59  ;;  %v1620_v21 = vsel %vm1608_vm2, %v1598_v50, %v1601_v3  ;;  %v1613_v29 = vsel %vm1611_vm3, %v1601_v3, 2102212464 }
 0x1ce   : > { %v1619_v41 = vsel %vm1609_vm5, %v1616_v27, %v1618_v26  ;;  %v1621_v31 = vsel %vm1611_vm3, %v1607_v13, 1326507024  ;;  %v1624_v32 = vshll.u32 %v1584_v17, 8  ;;  %v1592_v45 = vshrl.u32 %v2270_v54, %v1591_v35 }
 0x1cf   : > { %v1906_v6 = vmin.u32 %v1746_v37, %v1744_v33  ;;  %v1622_v52 = vsel %vm1610_vm4, %v1604_v20, %v1621_v31  ;;  %v1462_v19 = vand.u32 3, %v1461_v1  ;;  %v1614_v53 = vsel %vm1610_vm4, %v1598_v50, %v1613_v29 }
 0x1d0   : > { %v1623_v61 = vsel %vm1609_vm5, %v1620_v21, %v1622_v52  ;;  %v3137_v63 = vmul.u32.u64.low %v1624_v32, %v1619_v41  ;;  %v3138_v25 = vmul.u32.u64.high %v1624_v32, %v1619_v41, %v3137_v63  ;;  %v1612_v16 = vsel %vm1608_vm2, %v1592_v45, %v1595_v22 }
 0x1d1   : > { %v1748_v38 = vclz %v1906_v6  ;;  %v3144_v44 = vmul.u32.u64.low %v1624_v32, %v1623_v61  ;;  %v3145_v10 = vmul.u32.u64.high %v1624_v32, %v1623_v61, %v3144_v44  ;;  %vm1463_vm6 = vcmp.lt.s32.totalorder %v1462_v19, 2 }
 0x1d2   : > { %v1615_v42 = vsel %vm1609_vm5, %v1612_v16, %v1614_v53  ;;  %v1634_v30 = vadd.s32 1, %v3138_v25  ;;  %vm1464_vm7 = vcmp.eq.s32.totalorder %v1462_v19, 0  ;;  %vm1467_vm8 = vcmp.eq.s32.totalorder %v1462_v19, 2 }
 0x1d3   : > { %v1907_v35 = vadd.s32 4294967294, %v1748_v38  ;;  %v1736_v12 = vadd.s32 %v3056_v24, %v3062_v48  ;;  %vm1633_vm10 = vc.u32 %v3145_v10, %v3137_v63  ;;  %v1631_v4 = vmul.u32 %v1624_v32, %v1615_v42 }
 0x1d4   : > { %v2193_v54 = vpop.eup %2192  ;;  %vm1460_vm13 = vweird.f32 %v2789_v46  ;;  %v1635_v22 = vsel %vm1633_vm10, %v1634_v30, %v3138_v25  ;;  %v1766_v46 = vsub.s32 4, %v3108_v43  ;;  %vm1682_vm11 = vcmp.lt.s32.totalorder %v2895_v51, 0 }
 0x1d5   : > { %v2195_v49 = vpop.eup %2194  ;;  %v1468_v23 = vxor.u32 2147483648, %v2193_v54  ;;  %vm1908_vm9 = vcmp.lt.s32.totalorder %v1907_v35, 0  ;;  %v1636_v58 = vadd.s32 %v1635_v22, %v1631_v4  ;;  %vm1681_vm12 = vcmp.le.f32.partialorder %v1680_v0, 0.7853982 }
 0x1d6   : > { %v1465_v7 = vxor.u32 2147483648, %v2195_v49  ;;  %v1751_v15 = vsel %vm1908_vm9, 0, %v1907_v35  ;;  %v1767_v13 = vsel %vm1682_vm11, %v1766_v46, %v3108_v43  ;;  %v1632_v29 = vadd.s32 %v3137_v63, %v3145_v10 }
 0x1d7   : > { %v1469_v47 = vsel %vm1467_vm8, %v1468_v23, %v2195_v49  ;;  %v1752_v5 = vsub.s32 32, %v1751_v15  ;;  %v1756_v39 = vsub.s32 4294967266, %v1751_v15  ;;  %v1753_v40 = vshll.u32 %v1744_v33, %v1751_v15 }
 0x1d8   : > { %v1466_v34 = vsel %vm1464_vm7, %v2193_v54, %v1465_v7  ;;  %v1637_v60 = vadd.s32 536870912, %v1636_v58  ;;  %v1769_v59 = vsel %vm1681_vm12, 0, %v1767_v13  ;;  %vm1772_vm2 = vweird.f32 %v2895_v51 }
 0x1d9   : > { %v1470_v56 = vsel %vm1463_vm6, %v1466_v34, %v1469_v47  ;;  %v1754_v28 = vshrl.u32 %v1736_v12, %v1752_v5  ;;  %v1757_v18 = vadd.s32 127, %v1756_v39  ;;  %v1773_v26 = vadd.s32 3, %v1769_v59 }
 0x1da   : > { %v1471_v8 = vsel %vm1460_vm13, nan, %v1470_v56  ;;  %v1638_v50 = vshrl.u32 %v1637_v60, 30  ;;  %vm1578_vm3 = vcmp.lt.s32.totalorder %v2971_v55, 0  ;;  %vm1577_vm4 = vcmp.le.f32.partialorder %v1576_v2, 0.7853982 }
 0x1db   : > { %1788 = vst [vmem:[%s2763_s6 + $0x20] sm:$0xff] %v1471_v8  ;;  %v1755_v24 = vor.u32 %v1754_v28, %v1753_v40  ;;  %v1758_v48 = vshll.u32 %v1757_v18, 23  ;;  %v1774_v32 = vand.u32 3, %v1773_v26  ;;  %vm1668_vm8 = vweird.f32 %v2971_v55 }
 0x1dc   : > { %v1639_v20 = vshll.u32 %v1638_v50, 30  ;;  %v1662_v23 = vsub.s32 4, %v1638_v50 }
 0x1dd   : > { %v1759_v14 = vor.u32 4788187, %v1758_v48  ;;  %v1762_v62 = vcvt.s32.f32 %v1755_v24  ;;  %vm1779_vm15 = vcmp.eq.s32.totalorder %v1774_v32, 2  ;;  %vm1776_vm0 = vcmp.eq.s32.totalorder %v1774_v32, 0 }
 0x1de   : > { %v1640_v9 = vsub.s32 %v1636_v58, %v1639_v20  ;;  %vm1775_vm1 = vcmp.lt.s32.totalorder %v1774_v32, 2  ;;  %v1663_v7 = vsel %vm1578_vm3, %v1662_v23, %v1638_v50 }
 0x1df   : > { %v1760_v57 = vand.u32 2147483647, %v1759_v14  ;;  %v1665_v12 = vsel %vm1577_vm4, 0, %v1663_v7 }
 0x1e0   : > { %v1642_v3 = vsub.s32 0, %v1640_v9 }
 0x1e1   : > { %v1763_v11 = vmul.f32 %v1762_v62, %v1760_v57 }
 0x1e2   : > { %v1902_v33 = vmin.u32 %v1642_v3, %v1640_v9 }
 0x1e3   : > { %v1764_v36 = vxor.u32 2147483648, %v1763_v11 }
 0x1e4   : > { %v1644_v1 = vclz %v1902_v33 }
 0x1e5   : > { %v1765_v17 = vsel %vm1682_vm11, %v1764_v36, %v1763_v11 }
 0x1e6   : > { %v1768_v27 = vsel %vm1681_vm12, %v2895_v51, %v1765_v17  ;;  %v1903_v37 = vadd.s32 4294967294, %v1644_v1  ;;  %v1669_v51 = vadd.s32 3, %v1665_v12 }
 0x1e7   : > { %2196 = vcosq.f32 %v1768_v27 }
 0x1e8   : > { %2198 = vsinq.f32 %v1768_v27  ;;  %vm1904_vm14 = vcmp.lt.s32.totalorder %v1903_v37, 0  ;;  %v1670_v15 = vand.u32 3, %v1669_v51 }
 0x1e9   : > { %v1647_v21 = vsel %vm1904_vm14, 0, %v1903_v37 }
 0x1ea   : > { %v1648_v41 = vsub.s32 32, %v1647_v21  ;;  %v1652_v31 = vsub.s32 4294967266, %v1647_v21  ;;  %v1649_v0 = vshll.u32 %v1640_v9, %v1647_v21  ;;  %vm1675_vm5 = vcmp.eq.s32.totalorder %v1670_v15, 2 }
 0x1eb   : > { %vm1672_vm6 = vcmp.eq.s32.totalorder %v1670_v15, 0  ;;  %vm1671_vm7 = vcmp.lt.s32.totalorder %v1670_v15, 2 }
 0x1ec   : > { %v1650_v6 = vshrl.u32 %v1632_v29, %v1648_v41  ;;  %v1653_v45 = vadd.s32 127, %v1652_v31 }
 0x1ee   : > { %v1651_v52 = vor.u32 %v1650_v6, %v1649_v0  ;;  %v1654_v19 = vshll.u32 %v1653_v45, 23 }
 0x1f0   : > { %v1655_v16 = vor.u32 4788187, %v1654_v19  ;;  %v1658_v10 = vcvt.s32.f32 %v1651_v52 }
 0x1f1   : > { %v2197_v43 = vpop.eup %2196 }
 0x1f2   : > { %v2199_v61 = vpop.eup %2198  ;;  %v1780_v25 = vxor.u32 2147483648, %v2197_v43  ;;  %v1656_v63 = vand.u32 2147483647, %v1655_v16 }
 0x1f3   : > { %v1777_v38 = vxor.u32 2147483648, %v2199_v61 }
 0x1f4   : > { %v1781_v53 = vsel %vm1779_vm15, %v1780_v25, %v2199_v61  ;;  %v1659_v49 = vmul.f32 %v1658_v10, %v1656_v63 }
 0x1f5   : > { %v1778_v44 = vsel %vm1776_vm0, %v2197_v43, %v1777_v38 }
 0x1f6   : > { %v1782_v54 = vsel %vm1775_vm1, %v1778_v44, %v1781_v53  ;;  %v1660_v42 = vxor.u32 2147483648, %v1659_v49 }
 0x1f7   : > { %v1783_v35 = vsel %vm1772_vm2, nan, %v1782_v54 }
 0x1f8   : > { %1791 = vst [vmem:[%s2763_s6 + $0x38] sm:$0xff] %v1783_v35  ;;  %v1661_v30 = vsel %vm1578_vm3, %v1660_v42, %v1659_v49 }
 0x1f9   : > { %v1664_v47 = vsel %vm1577_vm4, %v2971_v55, %v1661_v30 }
 0x1fa   : > { %2200 = vcosq.f32 %v1664_v47 }
 0x1fb   : > { %2202 = vsinq.f32 %v1664_v47 }
 0x204   : > { %v2201_v34 = vpop.eup %2200 }
 0x205   : > { %v2203_v5 = vpop.eup %2202  ;;  %v1676_v39 = vxor.u32 2147483648, %v2201_v34 }
 0x206   : > { %v1673_v4 = vxor.u32 2147483648, %v2203_v5 }
 0x207   : > { %v1677_v2 = vsel %vm1675_vm5, %v1676_v39, %v2203_v5 }
 0x208   : > { %v1674_v56 = vsel %vm1672_vm6, %v2201_v34, %v1673_v4 }
 0x209   : > { %v1678_v40 = vsel %vm1671_vm7, %v1674_v56, %v1677_v2 }
 0x20a   : > { %v1679_v22 = vsel %vm1668_vm8, nan, %v1678_v40 }
 0x20b   : > { %1790 = vst [vmem:[%s2763_s6 + $0x30] sm:$0xff] %v1679_v22 }
 0x20c   : > { %2219 = shalt.err (!%p2216_p3)
}
 0x20d   : > { %s2220_s29 = scalar_lea.hbm %s3175_s24, 1024  ;;  %s2224_s4 = scalar_lea.hbm %s3226_s2, 2048 }
 0x20e   : > { %p2221_p4 = scmp.ne.s32.totalorder %s3175_s24, %s2220_s29  ;;  %p2225_p9 = scmp.lt.u32.totalorder %s3175_s24, %s3226_s2 }
 0x20f   : > { %p2226_p10 = scmp.lt.u32.totalorder %s2224_s4, %s2220_s29  ;;  %p2228_p12 = scmp.lt.u32.totalorder %s2220_s29, %s3175_s24 }
 0x210   : > { %p2222_p7 = pnand %p2221_p4, %p2332_p5 }
 0x211   : > { %p2227_p11 = por %p2226_p10, %p2225_p9 }
 0x212   : > { %p2223_p8 = pneg %p2222_p7 }
 0x213   : > { %p2229_p13 = por %p2228_p12, %p2227_p11 }
 0x215   : > { %p2230_p0 = pnand %p2229_p13, %p2223_p8 }
 0x217   : > { %2233 = shalt.err (!%p2230_p0)
}
 0x218   : > { %s2277_s7 = smov 128   ;;  %s2278_s8 = smov 8  }
 0x219   : > { %2125 = dma.vmem_to_hbm [thread:$0]  (%p2332_p5), %s3177_s21, 1024, %s3175_s24, %s3183_s13, %s2277_s7, %s2277_s7, %s2278_s8  }
 0x21a PF: > { %p2131_p1 = scmp.ge.s32.totalorder %s2268_s12, 2  ;;  %s1821_s14 = sand.u32 1, %s2256_s9  }
 0x21b   : > { %s1822_s16 = scalar_lea.sflag [#allocation3], %s1821_s14 }
 0x21c   : > { %p2128_p2 = pnand %p2131_p1, %p2336_p6 }
 0x21e   : > { %2251 = dma.done.wait (!%p2128_p2), %s1822_s16, 1024  }
 0x21f   : > { %2253 = vsyncadd (!%p2128_p2), %s1822_s16, 4294966272  ;;  %p12_p3 = scmp.ge.s32.totalorder %s2319_s15, 4   ;;  %s3241_s9 = smov %s2260_s10 }
 0x220   : > { %s3242_s10 = smov %s2264_s11  ;;  %s3243_s11 = smov %s2330_s18 }
 0x221   : > { %s3244_s12 = smov %s2319_s15  ;;  %14 = sbr.rel (!%p12_p3) target bundleno = 3 (0x3), region = 63 }
 0x228   :  { %1827 = vsyncpa [#allocation3], 1 }
 0x229   :  { %1829 = vsyncpa [#allocation3 + $0x1], 1 }

</bundles_post_ra>
